<compile_context>
chip_gen: v6e
topology: v6e:2x2x1
jax: 0.10.0
libtpu: 0.0.40
codegen_flags: <defaults>
</compile_context>

<pallas_src>
import functools

import jax
import jax.numpy as jnp
from jax.experimental import pallas as pl
from jax.experimental.pallas import tpu as pltpu


def _rtnet_stats_kernel(tgt_ref, src_ref, out_ref, *, inv_m, inv_n):
    """Inputs are lane-major: tgt_ref (3, M), src_ref (3, N), f32.

    Packed output (8, 128) f32:
      out[0:3, 0:3] = centered covariance  cov[a, b] = sum_m src_c[a, m] * tgt_c[b, m]
      out[0:3, 3]   = target mean
      out[0:3, 4]   = source mean
    """
    tgt = tgt_ref[...]                                        # (3, M) in VMEM
    src = src_ref[...]                                        # (3, N) in VMEM

    # Means as lane reductions over full vregs.
    tc = jnp.sum(tgt, axis=-1, keepdims=True) * inv_m         # (3, 1)
    sc = jnp.sum(src, axis=-1, keepdims=True) * inv_n         # (3, 1)

    # Center before the covariance (numerically identical to the reference).
    tgt_c = tgt - tc                                           # lane-broadcast
    src_c = src - sc

    out_ref[...] = jnp.zeros_like(out_ref)                     # one full-block store

    # 9-entry covariance on the VPU/XLU: broadcast-multiply + lane reductions.
    # Unrolled static loop (3 iterations); no MXU, no in-kernel transpose.
    for j in range(3):
        t_row = tgt_c[j:j + 1, :]                              # (1, M)
        out_ref[0:3, j:j + 1] = jnp.sum(src_c * t_row, axis=-1, keepdims=True)

    out_ref[0:3, 3:4] = tc
    out_ref[0:3, 4:5] = sc


def _rtnet_stats(tgt_lm, src_lm):
    """Pallas call: (3, M), (3, N) lane-major f32 -> packed (8, 128) stats block."""
    M = tgt_lm.shape[1]
    N = src_lm.shape[1]
    return pl.pallas_call(
        functools.partial(_rtnet_stats_kernel, inv_m=1.0 / M, inv_n=1.0 / N),
        out_shape=jax.ShapeDtypeStruct((8, 128), jnp.float32),
        # No grid: single invocation, full-array VMEM residency, no pipeline.
        in_specs=[
            pl.BlockSpec(memory_space=pltpu.MemorySpace.VMEM),
            pl.BlockSpec(memory_space=pltpu.MemorySpace.VMEM),
        ],
        out_specs=pl.BlockSpec(memory_space=pltpu.MemorySpace.VMEM),
    )(tgt_lm, src_lm)


@jax.jit
def _rtnet_forward_impl(target_points, source_points):
    # Lane-major prep (free for XLA under jit).
    tgt_lm = jnp.transpose(target_points[0].astype(jnp.float32))   # (3, M)
    src_lm = jnp.transpose(source_points[0].astype(jnp.float32))   # (3, N)

    packed = _rtnet_stats(tgt_lm, src_lm)
    cov = packed[0:3, 0:3]          # (3, 3) centered covariance
    tc = packed[0:3, 3]             # (3,)   target mean
    sc = packed[0:3, 4]             # (3,)   source mean

    # TODO(synk): 3x3 SVD / det have no Pallas equivalent; jitted JAX epilogue.
    u, _, vh = jnp.linalg.svd(cov, full_matrices=True)
    v = vh.T                                   # torch.svd returns V (not V^T)
    v_neg = v.at[:, 2].multiply(-1.0)          # negate last COLUMN (Kabsch reflection fix)
    rot_mat_pos = v @ u.T
    rot_mat_neg = v_neg @ u.T
    det = jnp.linalg.det(rot_mat_pos)
    R_target_source = jnp.where(det > 0.0, rot_mat_pos, rot_mat_neg)   # (3, 3)
    t_target_source = -(R_target_source @ sc) + tc                     # (3,)
    return R_target_source[None, ...], t_target_source[None, ...]      # (1,3,3), (1,3)


def rtnet_forward(target_points, source_points, correspondences=None):
    B, M, _ = target_points.shape
    _, N, _ = source_points.shape
    assert B == 1
    # The reference covariance (1,3,N) @ (1,M,3) implicitly requires M == N
    # (index-wise pairing of source/target points).
    assert M == N, "RTNet covariance requires M == N"
    # `correspondences` only feeds target_points_predicted, which the reference
    # forward never uses or returns -> dropped (dead code).
    del correspondences
    return _rtnet_forward_impl(target_points, source_points)


if __name__ == "__main__":
    key = jax.random.PRNGKey(0)
    k1, k2 = jax.random.split(key, 2)
    B, M, N = 1, 64, 64

    # Build a known rigid transform so the forward can be validated end-to-end.
    ca, sa = jnp.cos(0.7), jnp.sin(0.7)
    cb, sb = jnp.cos(-0.4), jnp.sin(-0.4)
    rot_z = jnp.array([[ca, -sa, 0.0], [sa, ca, 0.0], [0.0, 0.0, 1.0]], jnp.float32)
    rot_x = jnp.array([[1.0, 0.0, 0.0], [0.0, cb, -sb], [0.0, sb, cb]], jnp.float32)
    R_true = rot_z @ rot_x
    t_true = jnp.array([0.5, -1.25, 2.0], jnp.float32)

    source_points = jax.random.normal(k1, (B, N, 3), dtype=jnp.float32)
    target_points = source_points @ R_true.T + t_true            # target = R src + t
    correspondences = jax.random.uniform(
        k2, (B, M, N), dtype=jnp.float32, minval=0.1, maxval=1.0)

    R, t = rtnet_forward(target_points, source_points, correspondences)
    jax.block_until_ready((R, t))
    assert R.shape == (1, 3, 3) and t.shape == (1, 3)

    # 1) Check the Pallas-computed statistics against pure JAX.
    tgt = target_points[0]
    src = source_points[0]
    packed = _rtnet_stats(jnp.transpose(tgt), jnp.transpose(src))
    jax.block_until_ready(packed)
    cov_k = packed[0:3, 0:3]
    tc_k = packed[0:3, 3]
    sc_k = packed[0:3, 4]
    tc_ref = jnp.mean(tgt, axis=0)
    sc_ref = jnp.mean(src, axis=0)
    cov_ref = (src - sc_ref).T @ (tgt - tc_ref)
    assert jnp.allclose(tc_k, tc_ref, atol=1e-5)
    assert jnp.allclose(sc_k, sc_ref, atol=1e-5)
    assert jnp.allclose(cov_k, cov_ref, atol=1e-3)

    # 2) End-to-end: the Kabsch solve must recover the generating transform.
    assert jnp.allclose(R[0], R_true, atol=2e-4)
    assert jnp.allclose(t[0], t_true, atol=2e-4)
    assert bool(jnp.all(jnp.isfinite(R))) and bool(jnp.all(jnp.isfinite(t)))
    # Orthonormality / proper rotation.
    assert jnp.allclose(R[0] @ R[0].T, jnp.eye(3), atol=1e-4)
    assert abs(float(jnp.linalg.det(R[0])) - 1.0) < 1e-4

    print("KERNEL_OK")
</pallas_src>

<mosaic_0001>
module attributes {stable_mosaic.version = 11 : i64} {
  func.func @_rtnet_stats_kernel(%arg0: memref<3x64xf32, #tpu.memory_space<vmem>>, %arg1: memref<3x64xf32, #tpu.memory_space<vmem>>, %arg2: memref<8x128xf32, #tpu.memory_space<vmem>>) attributes {dimension_semantics = [], scalar_prefetch = 0 : i64, scratch_operands = 0 : i64, tpu.core_type = #tpu.core_type<tc>} {
    %c0 = arith.constant 0 : index
    %c0_0 = arith.constant 0 : index
    %0 = vector.load %arg0[%c0, %c0_0] : memref<3x64xf32, #tpu.memory_space<vmem>>, vector<3x64xf32>
    %c0_1 = arith.constant 0 : index
    %c0_2 = arith.constant 0 : index
    %1 = vector.load %arg1[%c0_1, %c0_2] : memref<3x64xf32, #tpu.memory_space<vmem>>, vector<3x64xf32>
    %cst = arith.constant dense<0.000000e+00> : vector<3xf32>
    %2 = vector.multi_reduction <add>, %0, %cst [1] : vector<3x64xf32> to vector<3xf32>
    %3 = vector.shape_cast %2 : vector<3xf32> to vector<3x1xf32>
    %cst_3 = arith.constant 1.562500e-02 : f32
    %4 = vector.broadcast %cst_3 : f32 to vector<3x1xf32>
    %5 = arith.mulf %3, %4 : vector<3x1xf32>
    %cst_4 = arith.constant dense<0.000000e+00> : vector<3xf32>
    %6 = vector.multi_reduction <add>, %1, %cst_4 [1] : vector<3x64xf32> to vector<3xf32>
    %7 = vector.shape_cast %6 : vector<3xf32> to vector<3x1xf32>
    %cst_5 = arith.constant 1.562500e-02 : f32
    %8 = vector.broadcast %cst_5 : f32 to vector<3x1xf32>
    %9 = arith.mulf %7, %8 : vector<3x1xf32>
    %10 = vector.broadcast %5 : vector<3x1xf32> to vector<3x64xf32>
    %11 = arith.subf %0, %10 : vector<3x64xf32>
    %12 = vector.broadcast %9 : vector<3x1xf32> to vector<3x64xf32>
    %13 = arith.subf %1, %12 : vector<3x64xf32>
    %cst_6 = arith.constant 0.000000e+00 : f32
    %14 = vector.broadcast %cst_6 : f32 to vector<8x128xf32>
    %c0_7 = arith.constant 0 : index
    %c0_8 = arith.constant 0 : index
    %15 = vector.load %arg2[%c0_7, %c0_8] : memref<8x128xf32, #tpu.memory_space<vmem>>, vector<8x128xf32>
    tpu.vector_store %arg2[%c0_7, %c0_8], %14 {strides = array<i32>} : memref<8x128xf32, #tpu.memory_space<vmem>>, vector<8x128xf32>,
    %16 = vector.extract_strided_slice %11 {offsets = [0, 0], sizes = [1, 64], strides = [1, 1]} : vector<3x64xf32> to vector<1x64xf32>
    %17 = vector.broadcast %16 : vector<1x64xf32> to vector<3x64xf32>
    %18 = arith.mulf %13, %17 : vector<3x64xf32>
    %cst_9 = arith.constant dense<0.000000e+00> : vector<3xf32>
    %19 = vector.multi_reduction <add>, %18, %cst_9 [1] : vector<3x64xf32> to vector<3xf32>
    %20 = vector.shape_cast %19 : vector<3xf32> to vector<3x1xf32>
    %c0_10 = arith.constant 0 : index
    %c0_11 = arith.constant 0 : index
    %21 = vector.load %arg2[%c0_10, %c0_11] : memref<8x128xf32, #tpu.memory_space<vmem>>, vector<3x1xf32>
    tpu.vector_store %arg2[%c0_10, %c0_11], %20 {strides = array<i32>} : memref<8x128xf32, #tpu.memory_space<vmem>>, vector<3x1xf32>,
    %22 = vector.extract_strided_slice %11 {offsets = [1, 0], sizes = [1, 64], strides = [1, 1]} : vector<3x64xf32> to vector<1x64xf32>
    %23 = vector.broadcast %22 : vector<1x64xf32> to vector<3x64xf32>
    %24 = arith.mulf %13, %23 : vector<3x64xf32>
    %cst_12 = arith.constant dense<0.000000e+00> : vector<3xf32>
    %25 = vector.multi_reduction <add>, %24, %cst_12 [1] : vector<3x64xf32> to vector<3xf32>
    %26 = vector.shape_cast %25 : vector<3xf32> to vector<3x1xf32>
    %c0_13 = arith.constant 0 : index
    %c1 = arith.constant 1 : index
    %27 = vector.load %arg2[%c0_13, %c1] : memref<8x128xf32, #tpu.memory_space<vmem>>, vector<3x1xf32>
    tpu.vector_store %arg2[%c0_13, %c1], %26 {strides = array<i32>} : memref<8x128xf32, #tpu.memory_space<vmem>>, vector<3x1xf32>,
    %28 = vector.extract_strided_slice %11 {offsets = [2, 0], sizes = [1, 64], strides = [1, 1]} : vector<3x64xf32> to vector<1x64xf32>
    %29 = vector.broadcast %28 : vector<1x64xf32> to vector<3x64xf32>
    %30 = arith.mulf %13, %29 : vector<3x64xf32>
    %cst_14 = arith.constant dense<0.000000e+00> : vector<3xf32>
    %31 = vector.multi_reduction <add>, %30, %cst_14 [1] : vector<3x64xf32> to vector<3xf32>
    %32 = vector.shape_cast %31 : vector<3xf32> to vector<3x1xf32>
    %c0_15 = arith.constant 0 : index
    %c2 = arith.constant 2 : index
    %33 = vector.load %arg2[%c0_15, %c2] : memref<8x128xf32, #tpu.memory_space<vmem>>, vector<3x1xf32>
    tpu.vector_store %arg2[%c0_15, %c2], %32 {strides = array<i32>} : memref<8x128xf32, #tpu.memory_space<vmem>>, vector<3x1xf32>,
    %c0_16 = arith.constant 0 : index
    %c3 = arith.constant 3 : index
    %34 = vector.load %arg2[%c0_16, %c3] : memref<8x128xf32, #tpu.memory_space<vmem>>, vector<3x1xf32>
    tpu.vector_store %arg2[%c0_16, %c3], %5 {strides = array<i32>} : memref<8x128xf32, #tpu.memory_space<vmem>>, vector<3x1xf32>,
    %c0_17 = arith.constant 0 : index
    %c4 = arith.constant 4 : index
    %35 = vector.load %arg2[%c0_17, %c4] : memref<8x128xf32, #tpu.memory_space<vmem>>, vector<3x1xf32>
    tpu.vector_store %arg2[%c0_17, %c4], %9 {strides = array<i32>} : memref<8x128xf32, #tpu.memory_space<vmem>>, vector<3x1xf32>,
    return
  }
}

</mosaic_0001>

<bundles_post_ra>
// kernel: custom-call.60
= control target key start
LH: loop header
LB: loop body
LE: loop exit
PB: predicated region body
PF: predicated region fallthrough
CT: control target
= control target key end

     0   :  { %v327_v1 = vmov 0.0   ;;  %s347_s11 = smov 0   ;;  %s403_s0 = inlined_call_operand.vmem [shape: f32[6,3], index: 0, kind: input, shape index: {}]   ;;  %s404_s1 = inlined_call_operand.vmem [shape: f32[6,3], index: 1, kind: output, shape index: {0}]   ;;  %s405_s2 = inlined_call_operand.vmem [shape: f32[3], index: 2, kind: output, shape index: {1}]  }
   0x1   :  { %v32_v0 = vld [vmem:[%s403_s0] sm:$0xff]  ;;  %39 = vst [vmem:[#allocation2] sm:$0x1] %v327_v1 }
   0x2   :  { %38 = vst [vmem:[#allocation1] sm:$0xff] %v32_v0 }
   0x3 LB: > { %v47_v2 = vlaneseq  ;;  %v356_v4 = vstv %s325_s11  ;;  %s74_s0 = scalar_lea.vmem [#allocation1], %s325_s11  ;;  %s110_s12 = smov [#allocation1]  ;;  %v328_v58 = vmov 1.0   ;;  %s325_s11 = sphi %s347_s11, %s45_s11  }
   0x4   : > { %s132_s13 = scalar_lea.vmem [#allocation4], %s325_s11  ;;  %s148_s14 = smov [#allocation1] }
   0x5   : > { %v353_v3 = vshrl.u32 %v47_v2, 7  ;;  %v126_v47 = vand.u32 127, %v47_v2  ;;  %s149_s15 = smov [#allocation4] }
   0x7   : > { %vm51_vm0 = vcmp.gt.s32.totalorder %v353_v3, %v356_v4  ;;  %vm52_vm1 = vcmp.lt.s32.totalorder %v353_v3, 6  ;;  %v113_v3 = vmov %v353_v3  ;;  %vm371_vm12 = vcmp.eq.s32.totalorder %v126_v47, %v356_v4 }
   0x8   : > { %vm53_vm2 = vmand %vm51_vm0, %vm52_vm1  ;;  %vm117_vm9 = vcmp.gt.s32.totalorder %v113_v3, %v356_v4  ;;  %vm118_vm10 = vcmp.lt.s32.totalorder %v113_v3, 6  ;;  %v145_v59 = vld [vmem:[#allocation2] ss:$0 sm:$0xff]  ;;  %v152_v3 = vmov %v353_v3  ;;  %vm178_vm15 = vcmp.gt.s32.totalorder %v126_v47, %v356_v4 }
   0x9   : > { %v46_v5 = vld [vmem:[#allocation1] sm:$0xff]  ;;  %vm119_vm11 = vmand %vm117_vm9, %vm118_vm10  ;;  %vm157_vm13 = vcmp.lt.s32.totalorder %v152_v3, 6  ;;  %v169_v3 = vmov %v353_v3 }
   0xa   : > { %v54_v6 = vsel %vm53_vm2, %v46_v5, 0.0  ;;  %v75_v14 = vld [vmem:[%s74_s0] ss:$0 sm:$0xff]  ;;  %vm186_vm14 = vcmp.ge.s32.totalorder %v169_v3, %v356_v4 }
   0xb   : > { %v55_v7 = vmul.f32 %v54_v6, %v54_v6  ;;  %v76_v15 = vand.u32 2147483647, %v75_v14  ;;  %vm101_vm8 = vcmp.lt.f32.partialorder %v75_v14, 0.0  ;;  %v114_v44 = vld [vmem:[%s110_s12] sm:$0xff]  ;;  %vm187_vm0 = vmand %vm371_vm12, %vm186_vm14 }
   0xc   : > { %v120_v48 = vsel %vm119_vm11, %v114_v44, 0.0  ;;  %v155_v62 = vld [vmem:[%s148_s14] sm:$0xff]  ;;  %s165_s14 = smov %s148_s14 }
   0xd   : > { %v56_v8 = vrot.slane %v55_v7, 4  ;;  %v77_v20 = vmax.f32 %v76_v15, 0.0  ;;  %s190_s16 = scalar_lea.vmem %s165_s14, %s325_s11  ;;  %s45_s11 = sadd.s32 1, %s325_s11  }
   0xe   : > { %p42_p0 = scmp.ge.s32.totalorder %s45_s11, 3  }
   0xf   : > { %v57_v9 = vadd.f32 %v56_v8, %v55_v7 }
  0x11   : > { %v58_v10 = vrot.slane %v57_v9, 2 }
  0x13   : > { %v59_v11 = vadd.f32 %v58_v10, %v57_v9 }
  0x15   : > { %v60_v12 = vrot.slane %v59_v11, 1 }
  0x17   : > { %v61_v13 = vadd.f32 %v60_v12, %v59_v11  ;;  %v176_v12 = vld [vmem:[%s165_s14] sm:$0xff] }
  0x19   : > { %309 = vrsqrt.f32 %v61_v13  ;;  %vm64_vm3 = vcmp.eq.f32.partialorder %v61_v13, inf  ;;  %v67_v17 = vand.u32 2147483648, %v61_v13  ;;  %vm66_vm4 = vcmp.eq.f32.partialorder %v61_v13, 0.0 }
  0x26   : > { %v310_v16 = vpop.eup %309 }
  0x27   : > { %v63_v18 = vmul.f32 %v310_v16, %v61_v13 }
  0x29   : > { %v65_v19 = vsel %vm64_vm3, %v61_v13, %v63_v18 }
  0x2a   : > { %v68_v21 = vsel %vm66_vm4, %v67_v17, %v65_v19 }
  0x2b   : > { %v78_v22 = vand.u32 2147483647, %v68_v21 }
  0x2d   : > { %v79_v23 = vmax.f32 %v77_v20, %v78_v22 }
  0x2f   : > { %311 = vrcp.f32 %v79_v23  ;;  %vm91_vm7 = vcmp.eq.f32.partialorder %v79_v23, 0.0 }
  0x3c   : > { %v312_v24 = vpop.eup %311 }
  0x3d   : > { %v81_v25 = vmul.f32 %v312_v24, %v76_v15  ;;  %v84_v26 = vmul.f32 0.0, %v312_v24  ;;  %v88_v27 = vmul.f32 %v312_v24, %v78_v22 }
  0x3f   : > { %v82_v28 = vmul.f32 %v81_v25, %v81_v25  ;;  %v85_v29 = vmul.f32 %v84_v26, %v84_v26  ;;  %v89_v30 = vmul.f32 %v88_v27, %v88_v27 }
  0x41   : > { %v86_v31 = vadd.f32 %v85_v29, %v82_v28 }
  0x43   : > { %v90_v32 = vadd.f32 %v89_v30, %v86_v31 }
  0x45   : > { %313 = vrsqrt.f32 %v90_v32  ;;  %vm94_vm5 = vcmp.eq.f32.partialorder %v90_v32, inf  ;;  %v97_v34 = vand.u32 2147483648, %v90_v32  ;;  %vm96_vm6 = vcmp.eq.f32.partialorder %v90_v32, 0.0 }
  0x52   : > { %v314_v33 = vpop.eup %313 }
  0x53   : > { %v93_v35 = vmul.f32 %v314_v33, %v90_v32 }
  0x55   : > { %v95_v36 = vsel %vm94_vm5, %v90_v32, %v93_v35 }
  0x56   : > { %v98_v37 = vsel %vm96_vm6, %v97_v34, %v95_v36 }
  0x57   : > { %v99_v38 = vmul.f32 %v98_v37, %v79_v23 }
  0x59   : > { %v100_v39 = vsel %vm91_vm7, 0.0, %v99_v38 }
  0x5a   : > { %v102_v40 = vxor.u32 2147483648, %v100_v39 }
  0x5c   : > { %v103_v41 = vsel %vm101_vm8, %v100_v39, %v102_v40 }
  0x5d   : > { %v364_v42 = vsel %vm66_vm4, %v75_v14, %v103_v41  ;;  %315 = vrcp.f32 %v103_v41  ;;  %v104_v45 = vsub.f32 %v103_v41, %v75_v14 }
  0x5e   : > { %v109_v43 = vsub.f32 %v75_v14, %v364_v42 }
  0x60   : > { %317 = vrcp.f32 %v109_v43 }
  0x6a   : > { %v316_v46 = vpop.eup %315 }
  0x6b   : > { %v106_v49 = vmul.f32 %v316_v46, %v104_v45 }
  0x6d   : > { %v318_v50 = vpop.eup %317  ;;  %v108_v54 = vsel %vm66_vm4, 0.0, %v106_v49 }
  0x6e   : > { %v122_v51 = vmul.f32 %v318_v50, %v120_v48  ;;  %v138_v56 = vsel %vm371_vm12, %v108_v54, 0.0 }
  0x70   : > { %v123_v53 = vsel %vm66_vm4, 0.0, %v122_v51 }
  0x71   : > { %v128_v55 = vsel %vm371_vm12, %v123_v53, 0.0 }
  0x72   : > { %129 = vadd.xlane.f32.xlu0 %v128_v55 }
  0x76   : > { %139 = vadd.xlane.f32.xlu0 %v138_v56 }
  0xfb   : > { %v130_v57 = vpop.xlane.xlu0 %129 }
  0xfc   : > { %131 = vst [vmem:[#allocation4] sm:$0xff] %v130_v57 }
  0xfd   : > { %133 = vst [vmem:[%s132_s13] sm:$0x1] %v328_v58 }
  0xff   : > { %v140_v60 = vpop.xlane.xlu0 %139 }
 0x100   : > { %v146_v61 = vsel %vm371_vm12, %v140_v60, %v145_v59 }
 0x101   : > { %147 = vst [vmem:[#allocation2] sm:$0x1] %v146_v61 }
 0x104   : > { %v154_v63 = vld [vmem:[%s149_s15] sm:$0xff]  ;;  %s166_s15 = smov %s149_s15 }
 0x105   : > { %v156_v0 = vmul.f32 %v155_v62, %v154_v63  ;;  %v174_v11 = vld [vmem:[%s166_s15] sm:$0xff] }
 0x107   : > { %v158_v1 = vsel %vm157_vm13, %v156_v0, 0.0 }
 0x108   : > { %v159_v2 = vrot.slane %v158_v1, 4  ;;  %v202_v3 = vld [vmem:[#allocation2] sm:$0x1] (%p42_p0) }
 0x109   :  { %205 = vst [vmem:[#allocation3] sm:$0x1] (%p42_p0), %v202_v3 }
 0x10a   : > { %v160_v5 = vadd.f32 %v159_v2, %v158_v1 }
 0x10c   : > { %v161_v6 = vrot.slane %v160_v5, 2 }
 0x10e   : > { %v162_v7 = vadd.f32 %v161_v6, %v160_v5 }
 0x110   : > { %v163_v8 = vrot.slane %v162_v7, 1  ;;  %v257_v19 = vld [vmem:[#allocation3] sm:$0x1] (%p42_p0) }
 0x111   :  { %258 = vst [vmem:[%s405_s2] sm:$0x1] (%p42_p0), %v257_v19 }
 0x112   : > { %v164_v9 = vadd.f32 %v163_v8, %v162_v7 }
 0x114   : > { %v170_v10 = vmul.f32 %v164_v9, %v140_v60 }
 0x116   : > { %v175_v13 = vmul.f32 %v174_v11, %v170_v10 }
 0x118   : > { %v179_v14 = vsub.f32 %v176_v12, %v175_v13 }
 0x11a   : > { %v180_v15 = vsel %vm178_vm15, %v179_v14, %v176_v12 }
 0x11b   : > { %v188_v16 = vsel %vm187_vm0, %v174_v11, %v180_v15 }
 0x11c   : > { %189 = vst [vmem:[%s165_s14] sm:$0xff] %v188_v16 }
 0x121   :  { %44 = sbr.rel (!%p42_p0) target bundleno = 3 (0x3), region = 139 }
 0x123   : > { %v191_v17 = vld [vmem:[%s190_s16] ss:$0 sm:$0xff] }
 0x124   : > { %v196_v18 = vsel %vm371_vm12, %v364_v42, %v191_v17 }
 0x125   : > { %197 = vst [vmem:[%s190_s16] sm:$0x1] %v196_v18 }
 0x12c   :  { %v234_v4 = vld [vmem:[#allocation1] sm:$0xff] }
 0x12d   :  { %235 = vst [vmem:[%s404_s1] sm:$0xff] %v234_v4 }

// kernel: custom-call.61
= control target key start
LH: loop header
LB: loop body
LE: loop exit
PB: predicated region body
PF: predicated region fallthrough
CT: control target
= control target key end

     0   :  { %v70_v1 = vlaneseq  ;;  %vm84_vm1 = vcmask 23552   ;;  %s243_s0 = inlined_call_operand.vmem [shape: f32[3,3], index: 0, kind: input, shape index: {}]   ;;  %s244_s1 = inlined_call_operand.vmem [shape: f32[3,3], index: 1, kind: output, shape index: {}]  }
   0x1   :  { %v63_v0 = vld [vmem:[%s243_s0] sm:$0xf] }
   0x2   :  { %64 = vst [vmem:[#allocation1] sm:$0xf] %v63_v0  ;;  %v71_v3 = vand.u32 127, %v70_v1  ;;  %v73_v4 = vshrl.u32 %v70_v1, 7 }
   0x4   :  { %vm79_vm0 = vcmp.eq.s32.totalorder %v71_v3, 0  ;;  %vm75_vm2 = vcmp.eq.s32.totalorder %v71_v3, %v73_v4  ;;  %vm88_vm3 = vcmp.eq.s32.totalorder %v71_v3, 1  ;;  %vm99_vm4 = vcmp.eq.s32.totalorder %v71_v3, 2 }
   0x9   :  { %v68_v2 = vld [vmem:[#allocation1] sm:$0xf] }
   0xa   :  { %69 = vst [vmem:[#allocation0] sm:$0xf] %v68_v2 }
  0x11   :  { %v76_v5 = vld [vmem:[#allocation0] sm:$0xff] }
  0x12   :  { %v83_v6 = vld [vmem:[#allocation0 + $0x1] ss:$0 sm:$0xff]  ;;  %v80_v7 = vsel %vm79_vm0, %v76_v5, 1.0  ;;  %v94_v11 = vld [vmem:[#allocation0 + $0x2] ss:$0 sm:$0xff] }
  0x13   :  { %v85_v8 = vsel %vm84_vm1, %v83_v6, 0.0  ;;  %v81_v9 = vsel %vm75_vm2, %v80_v7, 0.0  ;;  %v96_v12 = vsel %vm84_vm1, %v94_v11, 0.0 }
  0x14   :  { %v89_v10 = vmul.f32 %v85_v8, %v81_v9 }
  0x16   :  { %90 = vadd.xlane.f32.xlu0 %v89_v10 }
  0x9f   :  { %v91_v13 = vpop.xlane.xlu0 %90 }
  0xa0   :  { %v92_v14 = vsel %vm88_vm3, %v91_v13, %v81_v9 }
  0xa1   :  { %v100_v15 = vmul.f32 %v96_v12, %v92_v14 }
  0xa3   :  { %101 = vadd.xlane.f32.xlu0 %v100_v15 }
 0x12c   :  { %v102_v16 = vpop.xlane.xlu0 %101 }
 0x12d   :  { %v103_v17 = vsel %vm99_vm4, %v102_v16, %v92_v14 }
 0x12e   :  { %104 = vst [vmem:[#allocation2] sm:$0xff] %v103_v17 }
 0x135   :  { %v109_v18 = vld [vmem:[#allocation2] sm:$0xf] }
 0x136   :  { %112 = vst [vmem:[#allocation3] sm:$0xf] %v109_v18 }
 0x13d   :  { %v174_v19 = vld [vmem:[#allocation3] sm:$0xf] }
 0x13e   :  { %175 = vst [vmem:[%s244_s1] sm:$0xf] %v174_v19 }

// kernel: custom-call.58
= control target key start
LH: loop header
LB: loop body
LE: loop exit
PB: predicated region body
PF: predicated region fallthrough
CT: control target
= control target key end

     0   :  { %v159_v0 = vmov 0.0   ;;  %vm41_vm0 = vcmask 7168   ;;  %vm59_vm1 = vcmask 15368   ;;  %vm76_vm2 = vcmask 1047553   ;;  %s176_s0 = inlined_call_operand.vmem [shape: f32[3,3], index: 0, kind: input, shape index: {}]   ;;  %s177_s1 = inlined_call_operand.vmem [shape: f32[3,3], index: 1, kind: output, shape index: {}]  }
   0x1   :  { %40 = vst [vmem:[#allocation2] sm:$0xff] %v159_v0  ;;  %v18_v1 = vld [vmem:[%s176_s0] sm:$0xf]  ;;  %vm77_vm3 = vmand %vm59_vm1, %vm76_vm2  ;;  %vm81_vm4 = vcmask 23568   ;;  %vm98_vm5 = vcmask 1047554  }
   0x2   :  { %19 = vst [vmem:[#allocation1] sm:$0xf] %v18_v1  ;;  %vm99_vm6 = vmand %vm81_vm4, %vm98_vm5 }
   0x8   :  { %v42_v2 = vld [vmem:[#allocation2] ss:$0 sm:$0xff] }
   0x9   :  { %v44_v3 = vmul.f32 %v42_v2, %v42_v2  ;;  %v51_v4 = vmul.f32 0.0, %v42_v2  ;;  %v38_v5 = vld [vmem:[#allocation1] sm:$0xf] }
   0xa   :  { %39 = vst [vmem:[#allocation0] sm:$0xf] %v38_v5 }
   0xb   :  { %45 = vadd.xlane.f32.xlu0 %v44_v3 }
   0xf   :  { %52 = vadd.xlane.f32.xlu0 %v51_v4 }
  0x11   :  { %v43_v6 = vld [vmem:[#allocation0] ss:$0 sm:$0xff]  ;;  %v63_v18 = vld [vmem:[#allocation0 + $0x1] ss:$0 sm:$0xff]  ;;  %v85_v30 = vld [vmem:[#allocation0 + $0x2] ss:$0 sm:$0xff] }
  0x12   :  { %v49_v10 = vld [vmem:[#allocation0] sm:$0xff] }
  0x94   :  { %v46_v7 = vpop.xlane.xlu0 %45 }
  0x95   :  { %v47_v8 = vsub.f32 %v43_v6, %v46_v7 }
  0x97   :  { %153 = vrsqrt.f32 %v47_v8 }
  0x98   :  { %v53_v9 = vpop.xlane.xlu0 %52 }
  0x99   :  { %v54_v11 = vsub.f32 %v49_v10, %v53_v9 }
  0xa4   :  { %v154_v12 = vpop.eup %153 }
  0xa5   :  { %v55_v13 = vmul.f32 %v154_v12, %v54_v11 }
  0xa7   :  { %v56_v14 = vsel %vm41_vm0, %v55_v13, 0.0 }
  0xa8   :  { %58 = vst [vmem:[#allocation2] sm:$0xff] %v56_v14 }
  0xaf   :  { %v61_v15 = vld [vmem:[#allocation2 + $0x1] ss:$0 sm:$0xff] }
  0xb0   :  { %v64_v16 = vmul.f32 %v61_v15, %v61_v15  ;;  %v71_v17 = vmul.f32 %v61_v15, %v56_v14 }
  0xb2   :  { %65 = vadd.xlane.f32.xlu1 %v64_v16 }
  0xb6   :  { %72 = vadd.xlane.f32.xlu1 %v71_v17 }
 0x13b   :  { %v66_v19 = vpop.xlane.xlu1 %65 }
 0x13c   :  { %v67_v20 = vsub.f32 %v63_v18, %v66_v19 }
 0x13e   :  { %155 = vrsqrt.f32 %v67_v20 }
 0x13f   :  { %v73_v21 = vpop.xlane.xlu1 %72 }
 0x140   :  { %v74_v22 = vsub.f32 %v49_v10, %v73_v21 }
 0x14b   :  { %v156_v23 = vpop.eup %155 }
 0x14c   :  { %v75_v24 = vmul.f32 %v156_v23, %v74_v22 }
 0x14e   :  { %v78_v25 = vsel %vm77_vm3, %v75_v24, 0.0 }
 0x14f   :  { %v79_v26 = vadd.f32 %v78_v25, %v56_v14 }
 0x151   :  { %80 = vst [vmem:[#allocation2] sm:$0xff] %v79_v26 }
 0x158   :  { %v83_v27 = vld [vmem:[#allocation2 + $0x2] ss:$0 sm:$0xff] }
 0x159   :  { %v93_v28 = vmul.f32 %v83_v27, %v79_v26  ;;  %v86_v29 = vmul.f32 %v83_v27, %v83_v27 }
 0x15b   :  { %94 = vadd.xlane.f32.xlu1 %v93_v28  ;;  %87 = vadd.xlane.f32.xlu0 %v86_v29 }
 0x1e4   :  { %v88_v31 = vpop.xlane.xlu0 %87  ;;  %v95_v33 = vpop.xlane.xlu1 %94 }
 0x1e5   :  { %v89_v32 = vsub.f32 %v85_v30, %v88_v31  ;;  %v96_v34 = vsub.f32 %v49_v10, %v95_v33 }
 0x1e7   :  { %157 = vrsqrt.f32 %v89_v32 }
 0x1f4   :  { %v158_v35 = vpop.eup %157 }
 0x1f5   :  { %v97_v36 = vmul.f32 %v158_v35, %v96_v34 }
 0x1f7   :  { %v100_v37 = vsel %vm99_vm6, %v97_v36, 0.0 }
 0x1f8   :  { %v101_v38 = vadd.f32 %v100_v37, %v79_v26 }
 0x1fa   :  { %102 = vst [vmem:[#allocation2] sm:$0xff] %v101_v38 }
 0x201   :  { %v107_v39 = vld [vmem:[#allocation2] sm:$0xf] }
 0x202   :  { %110 = vst [vmem:[#allocation3] sm:$0xf] %v107_v39 }
 0x209   :  { %v127_v40 = vld [vmem:[#allocation3] sm:$0xf] }
 0x20a   :  { %128 = vst [vmem:[%s177_s1] sm:$0xf] %v127_v40 }

// kernel: custom-call.59
= control target key start
LH: loop header
LB: loop body
LE: loop exit
PB: predicated region body
PF: predicated region fallthrough
CT: control target
= control target key end

     0   :  { %v40_v1 = vlaneseq  ;;  %v145_v11 = vmov -1.0   ;;  %s162_s0 = inlined_call_operand.vmem [shape: f32[1,3,3], index: 0, kind: input, shape index: {}]   ;;  %s163_s1 = inlined_call_operand.vmem [shape: f32[1,3,3], index: 1, kind: output, shape index: {}]  }
   0x1   :  { %v18_v0 = vld [vmem:[%s162_s0] sm:$0xf] }
   0x2   :  { %19 = vst [vmem:[#allocation1] sm:$0xf] %v18_v0  ;;  %v41_v3 = vand.u32 127, %v40_v1  ;;  %v44_v4 = vshrl.u32 %v40_v1, 7 }
   0x4   :  { %vm42_vm0 = vcmp.lt.s32.totalorder %v41_v3, 3  ;;  %vm51_vm1 = vcmp.ge.s32.totalorder %v44_v4, %v41_v3  ;;  %vm46_vm2 = vcmp.eq.s32.totalorder %v44_v4, %v41_v3  ;;  %vm65_vm4 = vcmp.eq.s32.totalorder %v41_v3, 0 }
   0x5   :  { %vm52_vm3 = vmand %vm51_vm1, %vm42_vm0  ;;  %vm62_vm5 = vcmp.eq.s32.totalorder %v41_v3, %v44_v4  ;;  %v66_v12 = vsel %vm65_vm4, 1.0, %v145_v11  ;;  %vm73_vm6 = vcmp.eq.s32.totalorder %v41_v3, 1  ;;  %vm83_vm7 = vcmp.eq.s32.totalorder %v41_v3, 2 }
   0x6   :  { %v67_v13 = vsel %vm62_vm5, %v66_v12, 0.0 }
   0x9   :  { %v38_v2 = vld [vmem:[#allocation1] sm:$0xf] }
   0xa   :  { %39 = vst [vmem:[#allocation0] sm:$0xf] %v38_v2 }
  0x11   :  { %v47_v5 = vld [vmem:[#allocation0] sm:$0xff] }
  0x12   :  { %v48_v6 = vsel %vm46_vm2, %v47_v5, 0.0  ;;  %v53_v7 = vsel %vm52_vm3, %v47_v5, 0.0 }
  0x13   :  { %49 = vadd.xlane.f32.xlu0 %v48_v6 }
  0x9c   :  { %v50_v8 = vpop.xlane.xlu0 %49 }
  0x9d   :  { %143 = vrcp.f32 %v50_v8  ;;  %vm90_vm8 = vweird.f32 %v50_v8 }
  0xaa   :  { %v144_v9 = vpop.eup %143 }
  0xab   :  { %v55_v10 = vmul.f32 %v144_v9, %v53_v7 }
  0xad   :  { %56 = vst [vmem:[#allocation4] sm:$0xff] %v55_v10 }
  0xb4   :  { %v69_v14 = vld [vmem:[#allocation4 + $0x1] ss:$0 sm:$0xff]  ;;  %v79_v17 = vld [vmem:[#allocation4 + $0x2] ss:$0 sm:$0xff] }
  0xb5   :  { %v70_v15 = vxor.u32 2147483648, %v69_v14  ;;  %v80_v19 = vxor.u32 2147483648, %v79_v17 }
  0xb7   :  { %v74_v16 = vmul.f32 %v70_v15, %v67_v13 }
  0xb9   :  { %75 = vadd.xlane.f32.xlu0 %v74_v16 }
 0x142   :  { %v76_v18 = vpop.xlane.xlu0 %75 }
 0x143   :  { %v77_v20 = vsel %vm73_vm6, %v76_v18, %v67_v13 }
 0x144   :  { %v84_v21 = vmul.f32 %v80_v19, %v77_v20 }
 0x146   :  { %85 = vadd.xlane.f32.xlu1 %v84_v21 }
 0x1cf   :  { %v86_v22 = vpop.xlane.xlu1 %85 }
 0x1d0   :  { %v87_v23 = vsel %vm83_vm7, %v86_v22, %v77_v20 }
 0x1d1   :  { %v89_v24 = vmul.f32 %v144_v9, %v87_v23 }
 0x1d3   :  { %v91_v25 = vsel %vm90_vm8, %v87_v23, %v89_v24 }
 0x1d4   :  { %92 = vst [vmem:[#allocation2] sm:$0xff] %v91_v25 }
 0x1db   :  { %v97_v26 = vld [vmem:[#allocation2] sm:$0xf] }
 0x1dc   :  { %100 = vst [vmem:[#allocation3] sm:$0xf] %v97_v26 }
 0x1e3   :  { %v117_v27 = vld [vmem:[#allocation3] sm:$0xf] }
 0x1e4   :  { %118 = vst [vmem:[%s163_s1] sm:$0xf] %v117_v27 }

// kernel: _rtnet_forward_impl.1
= control target key start
LH: loop header
LB: loop body
LE: loop exit
PB: predicated region body
PF: predicated region fallthrough
CT: control target
= control target key end

     0   :  { %vm13_vm0 = vcmask 518144   ;;  %v25_v4 = vlaneseq  ;;  %v64_v24 = vmov 0.0   ;;  %vm33_vm1 = vcmask 2048   ;;  %s109_s0 = inlined_call_operand.vmem [shape: f32[3,64], index: 0, kind: input, shape index: {}]   ;;  %s110_s1 = inlined_call_operand.vmem [shape: f32[3,64], index: 1, kind: input, shape index: {}]   ;;  %s111_s2 = inlined_call_operand.vmem [shape: f32[8,128], index: 2, kind: output, shape index: {}]  }
   0x1   :  { %v11_v0 = vld [vmem:[%s109_s0] sm:$0x7]  ;;  %24 = vst [vmem:[%s111_s2] sm:$0xff] %v64_v24  ;;  %vm43_vm2 = vcmask 10248   ;;  %vm53_vm3 = vcmask 18448   ;;  %vm55_vm4 = vcmask 26648   ;;  %vm57_vm5 = vcmask 34848  }
   0x2   :  { %v12_v1 = vld [vmem:[%s110_s1] sm:$0x7]  ;;  %v14_v2 = vsel %vm13_vm0, %v11_v0, 0.0  ;;  %v26_v5 = vshrl.u32 %v25_v4, 7 }
   0x3   :  { %15 = vadd.xlane.f32.xlu0 %v14_v2  ;;  %v18_v3 = vsel %vm13_vm0, %v12_v1, 0.0 }
   0x4   :  { %v47_v9 = vsub.s32 2, %v26_v5  ;;  %v27_v10 = vsub.s32 0, %v26_v5  ;;  %v37_v13 = vsub.s32 1, %v26_v5 }
   0x7   :  { %19 = vadd.xlane.f32.xlu0 %v18_v3 }
  0x8c   :  { %v16_v6 = vpop.xlane.xlu0 %15 }
  0x8d   :  { %v17_v7 = vmul.f32 0.015625, %v16_v6 }
  0x8f   :  { %v22_v8 = vsub.f32 %v11_v0, %v17_v7 }
  0x90   :  { %v20_v11 = vpop.xlane.xlu0 %19 }
  0x91   :  { %v21_v12 = vmul.f32 0.015625, %v20_v11  ;;  %v48_v15 = vrot.slane %v22_v8, %v47_v9  ;;  %v28_v16 = vrot.slane %v22_v8, %v27_v10  ;;  %v38_v19 = vrot.slane %v22_v8, %v37_v13 }
  0x93   :  { %v23_v14 = vsub.f32 %v12_v1, %v21_v12 }
  0x95   :  { %v49_v17 = vmul.f32 %v48_v15, %v23_v14  ;;  %v29_v18 = vmul.f32 %v28_v16, %v23_v14  ;;  %v39_v22 = vmul.f32 %v38_v19, %v23_v14 }
  0x97   :  { %v50_v20 = vsel %vm13_vm0, %v49_v17, 0.0  ;;  %v30_v21 = vsel %vm13_vm0, %v29_v18, 0.0  ;;  %v40_v23 = vsel %vm13_vm0, %v39_v22, 0.0 }
  0x98   :  { %51 = vadd.xlane.f32.xlu0 %v50_v20  ;;  %31 = vadd.xlane.f32.xlu1 %v30_v21 }
  0x9c   :  { %41 = vadd.xlane.f32.xlu1 %v40_v23 }
 0x121   :  { %v32_v25 = vpop.xlane.xlu1 %31  ;;  %v52_v27 = vpop.xlane.xlu0 %51 }
 0x122   :  { %34 = vst.msk [vmem:[%s111_s2] sm:$0x7] %vm33_vm1, %v32_v25 }
 0x125   :  { %v42_v26 = vpop.xlane.xlu1 %41 }
 0x126   :  { %44 = vst.msk [vmem:[%s111_s2] sm:$0x7] %vm43_vm2, %v42_v26 }
 0x127   :  { %54 = vst.msk [vmem:[%s111_s2] sm:$0x7] %vm53_vm3, %v52_v27 }
 0x128   :  { %56 = vst.msk [vmem:[%s111_s2] sm:$0x7] %vm55_vm4, %v17_v7 }
 0x129   :  { %58 = vst.msk [vmem:[%s111_s2] sm:$0x7] %vm57_vm5, %v21_v12 }

// kernel: reverse
= control target key start
LH: loop header
LB: loop body
LE: loop exit
PB: predicated region body
PF: predicated region fallthrough
CT: control target
= control target key end

     0   :  { %v2_v0 = vlaneseq  ;;  %s130_s0 = inlined_call_operand.vmem [shape: f32[3], index: 0, kind: input, shape index: {}]   ;;  %s131_s1 = inlined_call_operand.vmem [shape: f32[3], index: 1, kind: output, shape index: {}]  }
   0x2   :  { %v3_v1 = vsub.s32 2, %v2_v0 }
   0x4   :  { %4 = vset.pattern.permute.xlu0 %v3_v1 }
   0x5   :  { %v46_v2 = vld [vmem:[#allocation1] sm:$0x1]  ;;  %v22_v3 = vld [vmem:[%s130_s0] sm:$0x1]  ;;  %v61_v10 = vshrl.u32 %v2_v0, 7 }
   0x6   :  { %47 = vst [vmem:[#allocation0] sm:$0x1] %v46_v2  ;;  %23 = vst [vmem:[#allocation1 + $0x1] sm:$0x1] %v22_v3 }
   0x7   :  { %vm62_vm0 = vcmp.lt.s32.totalorder %v61_v10, 1 }
   0xd   :  { %v49_v4 = vld [vmem:[#allocation0 + $0x7] ss:$-1 sm:$0xff]  ;;  %v43_v5 = vld [vmem:[#allocation1 + $0x1] sm:$0x1] }
   0xe   :  { %v50_v6 = vrot.slane %v49_v4, 7  ;;  %45 = vst [vmem:[#allocation0 + $0x8] sm:$0x1] %v43_v5 }
  0x10   :  { %51 = vperm.xlu0 %4, %v50_v6  }
  0x15   :  { %v56_v7 = vld [vmem:[#allocation0 + $0xf] ss:$-1 sm:$0xff] }
  0x16   :  { %v57_v8 = vrot.slane %v56_v7, 7 }
  0x18   :  { %58 = vperm.xlu0 %4, %v57_v8  }
  0x8b   :  { %v52_v9 = vpop.permute.xlu0 %51 }
  0x8c   :  { %53 = vst [vmem:[#allocation2] sm:$0xff] %v52_v9 }
  0x93   :  { %v59_v11 = vpop.permute.xlu0 %58 }
  0x94   :  { %63 = vst.msk [vmem:[#allocation2] sm:$0xff] %vm62_vm0, %v59_v11 }
  0x9b   :  { %v68_v12 = vld [vmem:[#allocation2] sm:$0x1] }
  0x9c   :  { %71 = vst [vmem:[#allocation3] sm:$0x1] %v68_v12 }
  0xa3   :  { %v88_v13 = vld [vmem:[#allocation3] sm:$0x1] }
  0xa4   :  { %89 = vst [vmem:[%s131_s1] sm:$0x1] %v88_v13 }

// kernel: custom-call.22
= control target key start
LH: loop header
LB: loop body
LE: loop exit
PB: predicated region body
PF: predicated region fallthrough
CT: control target
= control target key end

     0   :  { %v300_v3 = vlaneseq  ;;  %v1769_v5 = vmov 0.0   ;;  %s289_s17 = smov [#allocation22]  ;;  %s292_s18 = smov [#allocation23]  ;;  %s2051_s0 = inlined_call_operand.vmem [shape: f32[2,2], index: 0, kind: input, shape index: {}]   ;;  %s2052_s1 = inlined_call_operand.vmem [shape: f32[2,2], index: 1, kind: input, shape index: {}]   ;;  %s2053_s2 = inlined_call_operand.vmem [shape: f32[2,2], index: 2, kind: input, shape index: {}]   ;;  %s2054_s3 = inlined_call_operand.vmem [shape: f32[2,2], index: 3, kind: input, shape index: {}]   ;;  %s2055_s4 = inlined_call_operand.vmem [shape: f32[2], index: 4, kind: output, shape index: {0}]   ;;  %s2056_s5 = inlined_call_operand.vmem [shape: f32[2], index: 5, kind: output, shape index: {1}]   ;;  %s2057_s6 = inlined_call_operand.vmem [shape: f32[2,2], index: 6, kind: output, shape index: {2}]   ;;  %s2058_s7 = inlined_call_operand.vmem [shape: f32[2,2], index: 7, kind: output, shape index: {3}]   ;;  %s2059_s8 = inlined_call_operand.vmem [shape: f32[2,2], index: 8, kind: output, shape index: {4}]   ;;  %s2060_s9 = inlined_call_operand.vmem [shape: f32[2,2], index: 9, kind: output, shape index: {5}]  }
   0x1   :  { %v72_v0 = vld [vmem:[%s2051_s0] sm:$0x3]  ;;  %295 = vst [vmem:[#allocation12] sm:$0xff] %v1769_v5  ;;  %296 = vst [vmem:[#allocation14] sm:$0xff] %v1769_v5  ;;  %s299_s0 = smov [#allocation12]  ;;  %s1467_s19 = smov [#allocation20] }
   0x2   :  { %v135_v1 = vld [vmem:[%s2052_s1] sm:$0x3]  ;;  %73 = vst [vmem:[#allocation1] sm:$0x3] %v72_v0  ;;  %297 = vst [vmem:[#allocation16] sm:$0xff] %v1769_v5  ;;  %v1834_v6 = vand.u32 127, %v300_v3 }
   0x3   :  { %v198_v2 = vld [vmem:[%s2053_s2] sm:$0x3]  ;;  %136 = vst [vmem:[#allocation3] sm:$0x3] %v135_v1  ;;  %298 = vst [vmem:[#allocation18] sm:$0xff] %v1769_v5  ;;  %v1836_v7 = vshrl.u32 %v300_v3, 7 }
   0x4   :  { %199 = vst [vmem:[#allocation5] sm:$0x3] %v198_v2  ;;  %v261_v4 = vld [vmem:[%s2054_s3] sm:$0x3]  ;;  %v302_v6 = vmov %v1834_v6  ;;  %s312_s1 = smov [#allocation18]  ;;  %s283_s2 = smov [#allocation20] }
   0x5   :  { %262 = vst [vmem:[#allocation7] sm:$0x3] %v261_v4  ;;  %v305_v7 = vmov %v1836_v7  ;;  %v315_v6 = vmov %v1834_v6  ;;  %s286_s3 = smov [#allocation21]  ;;  %vm1471_vm2 = vcmp.lt.s32.totalorder %v1834_v6, 2  ;;  %s1484_s20 = smov [#allocation21] }
   0x6   :  { %v318_v7 = vmov %v1836_v7  ;;  %vm309_vm0 = vcmp.eq.s32.totalorder %v305_v7, %v302_v6  ;;  %s1501_s21 = smov [#allocation22]  ;;  %s1518_s22 = smov [#allocation23] }
   0x7   :  { %vm322_vm1 = vcmp.eq.s32.totalorder %v318_v7, %v315_v6  ;;  %v1463_v6 = vmov %v1834_v6  ;;  %v1466_v7 = vmov %v1836_v7 }
   0x8   :  { %v306_v12 = vld [vmem:[%s299_s0] sm:$0x3]  ;;  %vm1476_vm3 = vcmp.eq.s32.totalorder %v1466_v7, %v1463_v6  ;;  %v1514_v6 = vmov %v1834_v6  ;;  %v1483_v7 = vmov %v1836_v7 }
   0x9   :  { %v266_v8 = vld [vmem:[#allocation1] sm:$0x3]  ;;  %v310_v14 = vsel %vm309_vm0, 1.0, %v306_v12  ;;  %v1480_v6 = vmov %v1834_v6  ;;  %v1517_v7 = vmov %v1836_v7 }
   0xa   :  { %v271_v9 = vld [vmem:[#allocation3] sm:$0x3]  ;;  %267 = vst [vmem:[#allocation0] sm:$0x3] %v266_v8  ;;  %v319_v13 = vld [vmem:[%s312_s1] sm:$0x3]  ;;  %v1497_v6 = vmov %v1834_v6  ;;  %v1500_v7 = vmov %v1836_v7  ;;  %vm1527_vm4 = vcmp.eq.s32.totalorder %v1517_v7, %v1514_v6 }
   0xb   :  { %v276_v10 = vld [vmem:[#allocation5] sm:$0x3]  ;;  %272 = vst [vmem:[#allocation2] sm:$0x3] %v271_v9  ;;  %v323_v15 = vsel %vm322_vm1, 1.0, %v319_v13  ;;  %311 = vst [vmem:[%s299_s0] sm:$0x3] %v310_v14 }
   0xc   :  { %277 = vst [vmem:[#allocation4] sm:$0x3] %v276_v10  ;;  %v281_v11 = vld [vmem:[#allocation7] sm:$0x3]  ;;  %324 = vst [vmem:[%s312_s1] sm:$0x3] %v323_v15 }
   0xd   :  { %282 = vst [vmem:[#allocation6] sm:$0x3] %v281_v11 }
  0x11   :  { %v284_v16 = vld [vmem:[#allocation0] sm:$0xff] }
  0x12   :  { %v287_v17 = vld [vmem:[#allocation2] sm:$0xff]  ;;  %285 = vst [vmem:[%s283_s2] sm:$0xff] %v284_v16 }
  0x13   :  { %v290_v18 = vld [vmem:[#allocation4] sm:$0xff]  ;;  %288 = vst [vmem:[%s286_s3] sm:$0xff] %v287_v17 }
  0x14   :  { %291 = vst [vmem:[%s289_s17] sm:$0xff] %v290_v18  ;;  %v293_v19 = vld [vmem:[#allocation6] sm:$0xff] }
  0x15   :  { %294 = vst [vmem:[%s292_s18] sm:$0xff] %v293_v19 }
  0x19   :  { %v1473_v20 = vld [vmem:[%s1467_s19] sm:$0x3] }
  0x1a   :  { %v1490_v21 = vld [vmem:[%s1484_s20] sm:$0x3]  ;;  %v1474_v22 = vsel %vm1471_vm2, %v1473_v20, 0.0 }
  0x1b   :  { %v1491_v23 = vsel %vm1471_vm2, %v1490_v21, 0.0  ;;  %v1507_v24 = vld [vmem:[%s1501_s21] sm:$0x3]  ;;  %v1475_v26 = vmul.f32 %v1474_v22, %v1474_v22 }
  0x1c   :  { %v1524_v25 = vld [vmem:[%s1518_s22] sm:$0x3]  ;;  %v1492_v27 = vmul.f32 %v1491_v23, %v1491_v23  ;;  %v1508_v28 = vsel %vm1471_vm2, %v1507_v24, 0.0 }
  0x1d   :  { %v1525_v29 = vsel %vm1471_vm2, %v1524_v25, 0.0  ;;  %v1509_v30 = vmul.f32 %v1508_v28, %v1508_v28  ;;  %v1477_v33 = vsel %vm1476_vm3, 0.0, %v1475_v26 }
  0x1e   :  { %v1494_v31 = vadd.f32 %v1492_v27, %v1475_v26  ;;  %v1526_v32 = vmul.f32 %v1525_v29, %v1525_v29  ;;  %v1493_v34 = vadd.f32 %v1492_v27, %v1477_v33 }
  0x20   :  { %v1511_v35 = vadd.f32 %v1509_v30, %v1494_v31  ;;  %v1510_v36 = vadd.f32 %v1509_v30, %v1493_v34  ;;  %v1528_v37 = vsel %vm1527_vm4, 0.0, %v1526_v32 }
  0x22   :  { %v1530_v38 = vadd.f32 %v1526_v32, %v1511_v35  ;;  %v1529_v39 = vadd.f32 %v1528_v37, %v1510_v36 }
  0x24   :  { %1531 = vadd.xlane.f32.xlu0 %v1530_v38 }
  0x28   :  { %1539 = vadd.xlane.f32.xlu0 %v1529_v39 }
  0xad   :  { %v1532_v40 = vpop.xlane.xlu0 %1531 }
  0xae   :  { %v1533_v41 = vrot.slane %v1532_v40, 4 }
  0xb0   :  { %v1534_v42 = vadd.f32 %v1533_v41, %v1532_v40 }
  0xb1   :  { %v1540_v43 = vpop.xlane.xlu0 %1539 }
  0xb2   :  { %v1535_v44 = vrot.slane %v1534_v42, 2  ;;  %v1541_v45 = vrot.slane %v1540_v43, 4 }
  0xb4   :  { %v1542_v46 = vadd.f32 %v1541_v45, %v1540_v43  ;;  %v1536_v47 = vadd.f32 %v1535_v44, %v1534_v42 }
  0xb6   :  { %v1543_v48 = vrot.slane %v1542_v46, 2  ;;  %v1537_v50 = vrot.slane %v1536_v47, 1 }
  0xb8   :  { %v1544_v49 = vadd.f32 %v1543_v48, %v1542_v46  ;;  %v1538_v53 = vadd.f32 %v1537_v50, %v1536_v47 }
  0xba   :  { %v1545_v51 = vrot.slane %v1544_v49, 1 }
  0xbc   :  { %v1546_v52 = vadd.f32 %v1545_v51, %v1544_v49 }
  0xbe   :  { %1718 = vpush %v1546_v52 }
  0xbf   :  { %1720 = vpush %v1538_v53 }
  0xef   :  { %s1719_s23 = spop %1718 }
  0xf0   :  { %s1721_s24 = spop %1720 }
  0xf1   :  { %s1549_s25 = smul.f32 1e-10, %s1721_s24 }
  0xf3   :  { %p1550_p0 = scmp.le.f32.partialorder %s1719_s23, %s1549_s25 }
  0xf4   :  { %s1860_s26 = smov (!%p1550_p0), 0  }
  0xf5   :  { %1553 = sbr.rel (%p1550_p0) target bundleno = 927 (0x39f), region = 440 }
  0xfa LB: > { %s1865_s27 = smov 0   ;;  %s1763_s26 = sphi %s1860_s26, %s2061_s26  }
  0xfb LB: >> { %s429_s28 = smov [#allocation20]  ;;  %v433_v6 = vmov %v1834_v6  ;;  %v436_v7 = vmov %v1836_v7  ;;  %s449_s29 = smov [#allocation21]  ;;  %vm752_vm14 = vcmp.eq.s32.totalorder %v1836_v7, 0  ;;  %vm764_vm15 = vcmp.eq.s32.totalorder %v1836_v7, 1  ;;  %s1767_s27 = sphi %s1865_s27, %s428_s27  }
  0xfc   : >> { %v453_v6 = vmov %v1834_v6  ;;  %v456_v7 = vmov %v1836_v7  ;;  %v437_v54 = vld [vmem:[%s429_s28] sm:$0x3]  ;;  %vm440_vm5 = vcmp.eq.s32.totalorder %v436_v7, %v433_v6  ;;  %s469_s30 = smov [#allocation23]  ;;  %s430_s10 = smov [#allocation24] }
  0xfd   : >> { %vm460_vm6 = vcmp.eq.s32.totalorder %v456_v7, %v453_v6  ;;  %v473_v6 = vmov %v1834_v6  ;;  %v476_v7 = vmov %v1836_v7  ;;  %v441_v55 = vsel %vm440_vm5, %v437_v54, 0.0  ;;  %v457_v56 = vld [vmem:[%s449_s29] sm:$0x3]  ;;  %s450_s11 = smov [#allocation25]  ;;  %s470_s12 = smov [#allocation26] }
  0xfe   : >> { %vm480_vm7 = vcmp.eq.s32.totalorder %v476_v7, %v473_v6  ;;  %v442_v57 = vrot.slane %v441_v55, 4  ;;  %v461_v58 = vsel %vm460_vm6, %v457_v56, 0.0  ;;  %v477_v59 = vld [vmem:[%s469_s30] sm:$0x3]  ;;  %s493_s13 = smov [#allocation25]  ;;  %s491_s14 = smov [#allocation24]  ;;  %v542_v6 = vmov %v1834_v6 }
  0xff   : >> { %v462_v60 = vrot.slane %v461_v58, 4  ;;  %v481_v61 = vsel %vm480_vm7, %v477_v59, 0.0  ;;  %s495_s15 = smov [#allocation26]  ;;  %s530_s16 = smov [#allocation27]  ;;  %v545_v7 = vmov %v1836_v7  ;;  %v557_v6 = vmov %v1834_v6 }
 0x100   : >> { %v443_v62 = vadd.f32 %v442_v57, %v441_v55  ;;  %v482_v63 = vrot.slane %v481_v61, 4  ;;  %s532_s0 = smov [#allocation28]  ;;  %s489_s1 = smov [#allocation29]  ;;  %v560_v7 = vmov %v1836_v7  ;;  %vm547_vm12 = vcmp.eq.s32.totalorder %v545_v7, %v542_v6 }
 0x101   : >> { %v463_v0 = vadd.f32 %v462_v60, %v461_v58  ;;  %s490_s2 = smov [#allocation30]  ;;  %s534_s1 = smov %s489_s1  ;;  %vm562_vm13 = vcmp.eq.s32.totalorder %v560_v7, %v557_v6  ;;  %v655_v6 = vmov %v1834_v6  ;;  %v658_v7 = vmov %v1836_v7 }
 0x102   : >> { %v444_v1 = vrot.slane %v443_v62, 2  ;;  %v483_v2 = vadd.f32 %v482_v63, %v481_v61  ;;  %s536_s2 = smov %s490_s2  ;;  %s538_s3 = smov [#allocation29]  ;;  %v669_v6 = vmov %v1834_v6  ;;  %v672_v7 = vmov %v1836_v7 }
 0x103   : >> { %v464_v3 = vrot.slane %v463_v0, 2  ;;  %s553_s17 = smov [#allocation30]  ;;  %s551_s18 = smov [#allocation31]  ;;  %vm662_vm0 = vcmp.eq.s32.totalorder %v658_v7, %v655_v6  ;;  %v628_v6 = vmov %v1834_v6  ;;  %v631_v7 = vmov %v1836_v7 }
 0x104   : >> { %v445_v4 = vadd.f32 %v444_v1, %v443_v62  ;;  %v484_v5 = vrot.slane %v483_v2, 2  ;;  %s568_s19 = smov [#allocation31]  ;;  %s1880_s20 = smov [#allocation20]  ;;  %v642_v6 = vmov %v1834_v6  ;;  %v645_v7 = vmov %v1836_v7 }
 0x105   : >> { %v465_v8 = vadd.f32 %v464_v3, %v463_v0  ;;  %s566_s21 = smov [#allocation32]  ;;  %s1882_s22 = smov [#allocation21]  ;;  %v576_v53 = vld [vmem:[%s1880_s20] sm:$0x3]  ;;  %vm677_vm1 = vcmp.eq.s32.totalorder %v672_v7, %v669_v6  ;;  %vm636_vm3 = vcmp.eq.s32.totalorder %v631_v7, %v628_v6  ;;  %vm649_vm4 = vcmp.eq.s32.totalorder %v645_v7, %v642_v6 }
 0x106   : >> { %v446_v9 = vrot.slane %v445_v4, 1  ;;  %v485_v10 = vadd.f32 %v484_v5, %v483_v2  ;;  %s1884_s23 = smov [#allocation22]  ;;  %s1886_s24 = smov [#allocation23]  ;;  %v577_v54 = vld [vmem:[%s1882_s22] sm:$0x3]  ;;  %vm691_vm5 = vcmp.eq.s32.totalorder %v1834_v6, 0 }
 0x107   : >> { %v466_v11 = vrot.slane %v465_v8, 1  ;;  %s1888_s25 = smov [#allocation12]  ;;  %s1890_s28 = smov [#allocation14]  ;;  %v578_v55 = vld [vmem:[%s1884_s23] sm:$0x3]  ;;  %vm695_vm6 = vcmp.eq.s32.totalorder %v1834_v6, 1 }
 0x108   : >> { %v447_v12 = vadd.f32 %v446_v9, %v445_v4  ;;  %v486_v13 = vrot.slane %v485_v10, 1  ;;  %s1892_s29 = smov [#allocation16]  ;;  %s792_s30 = smov [#allocation31]  ;;  %v579_v56 = vld [vmem:[%s1886_s24] sm:$0x3] }
 0x109   : >> { %v467_v14 = vadd.f32 %v466_v11, %v465_v8  ;;  %v800_v57 = vld [vmem:[%s1888_s25] sm:$0x3]  ;;  %s428_s27 = sadd.s32 1, %s1767_s27  }
 0x10a   : >> { %448 = vst [vmem:[%s430_s10] sm:$0x1] %v447_v12  ;;  %v487_v15 = vadd.f32 %v486_v13, %v485_v10  ;;  %s1896_s10 = smov [#allocation18]  ;;  %v801_v58 = vld [vmem:[%s1890_s28] sm:$0x3]  ;;  %p425_p1 = scmp.ge.s32.totalorder %s428_s27, 3  }
 0x10b   : >> { %468 = vst [vmem:[%s450_s11] sm:$0x1] %v467_v14  ;;  %v802_v59 = vld [vmem:[%s1892_s29] sm:$0x3]  ;;  %s570_s11 = smov [#allocation32]  ;;  %v329_v6 = vmov (%p425_p1), %v1834_v6  ;;  %v332_v7 = vmov (%p425_p1), %v1836_v7 }
 0x10c   : >> { %488 = vst [vmem:[%s470_s12] sm:$0x1] %v487_v15  ;;  %v803_v61 = vld [vmem:[%s1896_s10] sm:$0x3]  ;;  %s794_s12 = smov [#allocation32]  ;;  %v382_v6 = vmov (%p425_p1), %v1834_v6  ;;  %vm344_vm7 = vcmp.eq.s32.totalorder (%p425_p1), %v332_v7, %v329_v6  ;;  %v385_v7 = vmov (%p425_p1), %v1836_v7 }
 0x10d   : > { %v348_v6 = vmov (%p425_p1), %v1834_v6  ;;  %v351_v7 = vmov (%p425_p1), %v1836_v7 }
 0x10e   : > { %v365_v6 = vmov (%p425_p1), %v1834_v6  ;;  %v368_v7 = vmov (%p425_p1), %v1836_v7 }
 0x111   : >> { %v492_v18 = vld [vmem:[%s491_s14] sm:$0xff]  ;;  %s598_s14 = smov [#allocation30] }
 0x112   : >> { %v494_v16 = vld [vmem:[%s493_s13] sm:$0xff]  ;;  %v515_v33 = vand.u32 2147483647, %v492_v18  ;;  %s596_s13 = smov [#allocation29] }
 0x113   : >> { %v498_v17 = vmul.f32 2.0, %v494_v16  ;;  %v496_v19 = vld [vmem:[%s495_s15] sm:$0xff]  ;;  %v516_v36 = vand.u32 2147483647, %v494_v16  ;;  %s1912_s15 = smov [#allocation12] }
 0x114   : >> { %v497_v20 = vsub.f32 %v496_v19, %v492_v18  ;;  %v517_v34 = vand.u32 2147483647, %v496_v19 }
 0x115   : >> { %1745 = vrcp.f32 %v498_v17 }
 0x116   : >> { %v518_v35 = vmin.f32 %v515_v33, %v517_v34 }
 0x118   : >> { %v519_v37 = vmul.f32 1.1920929e-08, %v518_v35 }
 0x11a   : >> { %vm520_vm11 = vcmp.le.f32.partialorder %v516_v36, %v519_v37 }
 0x122   : >> { %v1746_v21 = vpop.eup %1745 }
 0x123   : >> { %v500_v22 = vmul.f32 %v1746_v21, %v497_v20 }
 0x125   : >> { %v502_v23 = vmul.f32 %v500_v22, %v500_v22  ;;  %vm501_vm10 = vcmp.ge.f32.partialorder %v500_v22, 0.0 }
 0x127   : >> { %v503_v24 = vadd.f32 1.0, %v502_v23 }
 0x129   : >> { %1747 = vrsqrt.f32 %v503_v24  ;;  %vm506_vm8 = vcmp.eq.f32.partialorder %v503_v24, inf  ;;  %v509_v26 = vand.u32 2147483648, %v503_v24  ;;  %vm508_vm9 = vcmp.eq.f32.partialorder %v503_v24, 0.0 }
 0x136   : >> { %v1748_v25 = vpop.eup %1747 }
 0x137   : >> { %v505_v27 = vmul.f32 %v1748_v25, %v503_v24 }
 0x139   : >> { %v507_v28 = vsel %vm506_vm8, %v503_v24, %v505_v27  ;;  %vm397_vm8 = vcmp.eq.s32.totalorder (%p425_p1), %v385_v7, %v382_v6 }
 0x13a   : >> { %v510_v29 = vsel %vm508_vm9, %v509_v26, %v507_v28 }
 0x13b   : >> { %v511_v30 = vxor.u32 2147483648, %v510_v29 }
 0x13d   : >> { %v512_v31 = vsel %vm501_vm10, %v510_v29, %v511_v30 }
 0x13e   : >> { %v513_v32 = vadd.f32 %v512_v31, %v500_v22 }
 0x140   : >> { %1749 = vrcp.f32 %v513_v32 }
 0x14d   : >> { %v1750_v38 = vpop.eup %1749 }
 0x14e   : >> { %v521_v39 = vsel %vm520_vm11, 0.0, %v1750_v38 }
 0x14f   : >> { %v522_v40 = vmul.f32 %v521_v39, %v521_v39  ;;  %v526_v41 = vmul.f32 %v521_v39, %v494_v16 }
 0x151   : >> { %v523_v42 = vadd.f32 1.0, %v522_v40  ;;  %v527_v43 = vsub.f32 %v492_v18, %v526_v41  ;;  %v529_v44 = vadd.f32 %v526_v41, %v496_v19 }
 0x153   : >> { %1751 = vrsqrt.f32 %v523_v42  ;;  %531 = vst [vmem:[%s530_s16] sm:$0xff] %v527_v43  ;;  %533 = vst [vmem:[%s532_s0] sm:$0xff] %v529_v44  ;;  %s1914_s16 = smov [#allocation22]  ;;  %s1916_s0 = smov [#allocation23] }
 0x160   : >> { %v1752_v45 = vpop.eup %1751 }
 0x161   : >> { %535 = vst [vmem:[%s534_s1] sm:$0xff] %v1752_v45  ;;  %v525_v46 = vmul.f32 %v1752_v45, %v521_v39  ;;  %s1918_s1 = smov [#allocation20] }
 0x163   : >> { %537 = vst [vmem:[%s536_s2] sm:$0xff] %v525_v46  ;;  %s1920_s2 = smov [#allocation16] }
 0x168   : >> { %v539_v47 = vld [vmem:[%s538_s3] ss:$0 sm:$0xff]  ;;  %s1922_s3 = smov [#allocation14] }
 0x169   : >> { %v548_v48 = vsel %vm547_vm12, %v539_v47, 0.0  ;;  %v597_v27 = vld [vmem:[%s596_s13] ss:$0 sm:$0xff]  ;;  %s768_s13 = smov [#allocation21] }
 0x16a   : >> { %549 = vadd.xlane.f32.xlu0 %v548_v48  ;;  %v554_v49 = vld [vmem:[%s553_s17] ss:$0 sm:$0xff]  ;;  %s1926_s17 = smov [#allocation18] }
 0x16b   : >> { %v563_v50 = vsel %vm562_vm13, %v554_v49, 0.0  ;;  %v599_v28 = vld [vmem:[%s598_s14] ss:$0 sm:$0xff]  ;;  %s745_s14 = smov [#allocation22] }
 0x16e   : >> { %564 = vadd.xlane.f32.xlu0 %v563_v50 }
 0x1f3   : >> { %v550_v51 = vpop.xlane.xlu0 %549 }
 0x1f4   : >> { %552 = vst [vmem:[%s551_s18] sm:$0xff] %v550_v51  ;;  %s1928_s18 = smov [#allocation21] }
 0x1f7   : >> { %v565_v52 = vpop.xlane.xlu0 %564 }
 0x1f8   : >> { %567 = vst [vmem:[%s566_s21] sm:$0xff] %v565_v52  ;;  %s665_s21 = smov [#allocation23] }
 0x1fb   : >> { %v569_v60 = vld [vmem:[%s568_s19] sm:$0xff]  ;;  %s666_s19 = smov [#allocation28] }
 0x1fc   : >> { %v793_v62 = vld [vmem:[%s792_s30] sm:$0xff]  ;;  %v580_v63 = vmul.f32 %v576_v53, %v569_v60  ;;  %v583_v0 = vmul.f32 %v577_v54, %v569_v60  ;;  %v587_v1 = vmul.f32 %v578_v55, %v569_v60  ;;  %v590_v2 = vmul.f32 %v579_v56, %v569_v60  ;;  %s681_s30 = smov [#allocation21] }
 0x1fd   : >> { %v804_v3 = vmul.f32 %v800_v57, %v793_v62  ;;  %v807_v4 = vmul.f32 %v801_v58, %v793_v62  ;;  %v811_v5 = vmul.f32 %v802_v59, %v793_v62  ;;  %v814_v8 = vmul.f32 %v803_v61, %v793_v62 }
 0x1ff   : >> { %v571_v9 = vld [vmem:[%s570_s11] sm:$0xff]  ;;  %s1973_s11 = smov [#allocation23] }
 0x200   : >> { %v795_v10 = vld [vmem:[%s794_s12] sm:$0xff]  ;;  %v581_v11 = vmul.f32 %v578_v55, %v571_v9  ;;  %v584_v12 = vmul.f32 %v579_v56, %v571_v9  ;;  %v586_v13 = vmul.f32 %v576_v53, %v571_v9  ;;  %v589_v14 = vmul.f32 %v577_v54, %v571_v9  ;;  %s744_s12 = smov [#allocation20] }
 0x201   : >> { %v805_v15 = vmul.f32 %v802_v59, %v795_v10  ;;  %v808_v16 = vmul.f32 %v803_v61, %v795_v10  ;;  %v810_v17 = vmul.f32 %v800_v57, %v795_v10  ;;  %v813_v18 = vmul.f32 %v801_v58, %v795_v10  ;;  %v673_v59 = vld [vmem:[%s666_s19] ss:$0 sm:$0xff] }
 0x202   : >> { %v582_v19 = vsub.f32 %v580_v63, %v581_v11  ;;  %v585_v20 = vsub.f32 %v583_v0, %v584_v12  ;;  %v588_v21 = vadd.f32 %v587_v1, %v586_v13  ;;  %v591_v22 = vadd.f32 %v590_v2, %v589_v14 }
 0x203   : >> { %v806_v23 = vsub.f32 %v804_v3, %v805_v15  ;;  %v809_v24 = vsub.f32 %v807_v4, %v808_v16  ;;  %v812_v25 = vadd.f32 %v811_v5, %v810_v17  ;;  %v815_v26 = vadd.f32 %v814_v8, %v813_v18 }
 0x204   : >> { %593 = vst [vmem:[%s1882_s22] sm:$0x3] %v585_v20  ;;  %595 = vst [vmem:[%s1886_s24] sm:$0x3] %v591_v22  ;;  %s625_s22 = smov [#allocation27]  ;;  %s639_s24 = smov [#allocation21] }
 0x205   : >> { %592 = vst [vmem:[%s1880_s20] sm:$0x3] %v582_v19  ;;  %594 = vst [vmem:[%s1884_s23] sm:$0x3] %v588_v21  ;;  %s652_s20 = smov [#allocation22]  ;;  %s624_s23 = smov [#allocation20]  ;;  %v632_v63 = vld [vmem:[%s625_s22] ss:$0 sm:$0xff] }
 0x206   : >> { %816 = vst [vmem:[%s1888_s25] sm:$0x3] %v806_v23  ;;  %817 = vst [vmem:[%s1890_s28] sm:$0x3] %v809_v24  ;;  %s1970_s25 = smov [#allocation22]  ;;  %s1770_s28 = smov 1  }
 0x207   : >> { %818 = vst [vmem:[%s1892_s29] sm:$0x3] %v812_v25  ;;  %819 = vst [vmem:[%s1896_s10] sm:$0x3] %v815_v26  ;;  %s680_s29 = smov [#allocation20]  ;;  %s1771_s10 = smov 127  }
 0x20b   : >> { %v607_v30 = vld [vmem:[%s1916_s0] sm:$0x3] }
 0x20c   : >> { %v606_v29 = vld [vmem:[%s1914_s16] sm:$0x3]  ;;  %v615_v36 = vmul.f32 %v607_v30, %v599_v28  ;;  %v618_v42 = vmul.f32 %v607_v30, %v597_v27 }
 0x20d   : >> { %v604_v31 = vld [vmem:[%s1918_s1] sm:$0x3]  ;;  %v614_v35 = vmul.f32 %v606_v29, %v597_v27  ;;  %v617_v37 = vmul.f32 %v606_v29, %v599_v28 }
 0x20e   : >> { %v822_v32 = vld [vmem:[%s1912_s15] ss:$0 sm:$0xff]  ;;  %v1693_v34 = vld [vmem:[%s1912_s15 + $0x1] ss:$0 sm:$0xff]  ;;  %v608_v48 = vmul.f32 %v604_v31, %v597_v27  ;;  %v611_v49 = vmul.f32 %v604_v31, %v599_v28 }
 0x20f   : >> { %v1692_v33 = vld [vmem:[%s1912_s15 - $0x1] sm:$0x2]  ;;  %v1695_v40 = vld [vmem:[%s1920_s2 + $0x1] sm:$0x1]  ;;  %v616_v47 = vsub.f32 %v614_v35, %v615_v36  ;;  %v619_v53 = vadd.f32 %v618_v42, %v617_v37 }
 0x210   : >> { %v829_v38 = vsel %vm752_vm14, %v822_v32, %v1692_v33  ;;  %v833_v39 = vld [vmem:[%s1920_s2] ss:$0 sm:$0xff]  ;;  %v841_v43 = vsel %vm764_vm15, %v1693_v34, %v1695_v40  ;;  %v1697_v45 = vld [vmem:[%s1922_s3 + $0x1] ss:$0 sm:$0xff] }
 0x211   : >> { %v846_v41 = vld [vmem:[%s1922_s3] ss:$0 sm:$0xff]  ;;  %832 = vst [vmem:[%s1912_s15] sm:$0x3] %v829_v38  ;;  %843 = vst [vmem:[%s1920_s2] sm:$0x3] %v841_v43  ;;  %v1699_v51 = vld [vmem:[%s1926_s17 + $0x1] sm:$0x1] }
 0x212   : >> { %v1696_v44 = vld [vmem:[%s1922_s3 - $0x1] sm:$0x2]  ;;  %1694 = vst [vmem:[%s1912_s15 + $0x1] sm:$0x1] %v833_v39  ;;  %v865_v54 = vsel %vm764_vm15, %v1697_v45, %v1699_v51  ;;  %622 = vst [vmem:[%s1914_s16] sm:$0x3] %v616_v47  ;;  %s769_s15 = smov [#allocation23] }
 0x213   : >> { %v857_v46 = vld [vmem:[%s1926_s17] ss:$0 sm:$0xff]  ;;  %v853_v50 = vsel %vm752_vm14, %v846_v41, %v1696_v44  ;;  %623 = vst [vmem:[%s1916_s0] sm:$0x3] %v619_v53  ;;  %s868_s16 = sadd.s32 (%p425_p1), 1, %s1763_s26   ;;  %s333_s0 = smov (%p425_p1), [#allocation20] }
 0x214   : >> { %v605_v52 = vld [vmem:[%s1928_s18] sm:$0x3]  ;;  %856 = vst [vmem:[%s1922_s3] sm:$0x3] %v853_v50  ;;  %867 = vst [vmem:[%s1926_s17] sm:$0x3] %v865_v54  ;;  %s369_s2 = smov (%p425_p1), [#allocation22]  ;;  %p421_p2 = scmp.ge.s32.totalorder (%p425_p1), %s868_s16, 15 }
 0x215   : >> { %v609_v55 = vmul.f32 %v605_v52, %v599_v28  ;;  %v612_v56 = vmul.f32 %v605_v52, %v597_v27  ;;  %1698 = vst [vmem:[%s1922_s3 + $0x1] sm:$0x1] %v857_v46  ;;  %s386_s3 = smov (%p425_p1), [#allocation23]  ;;  %s2061_s26 = smov (%p425_p1), %s868_s16 }
 0x217   : >> { %v610_v57 = vsub.f32 %v608_v48, %v609_v55  ;;  %v613_v58 = vadd.f32 %v612_v56, %v611_v49 }
 0x219   : >> { %620 = vst [vmem:[%s1918_s1] sm:$0x3] %v610_v57  ;;  %621 = vst [vmem:[%s1928_s18] sm:$0x3] %v613_v58  ;;  %v659_v60 = vld [vmem:[%s652_s20] sm:$0x3]  ;;  %s352_s1 = smov (%p425_p1), [#allocation21] }
 0x21a   : >> { %v663_v61 = vsel %vm662_vm0, 0.0, %v659_v60  ;;  %v674_v62 = vld [vmem:[%s665_s21] sm:$0x3] }
 0x21b   : >> { %664 = vst [vmem:[%s652_s20] sm:$0x3] %v663_v61  ;;  %v678_v0 = vsel %vm677_vm1, %v673_v59, %v674_v62 }
 0x21c   : >> { %679 = vst [vmem:[%s665_s21] sm:$0x3] %v678_v0 }
 0x220   : >> { %v633_v1 = vld [vmem:[%s624_s23] sm:$0x3] }
 0x221   : >> { %v646_v2 = vld [vmem:[%s639_s24] sm:$0x3]  ;;  %v637_v3 = vsel %vm636_vm3, %v632_v63, %v633_v1 }
 0x222   : >> { %v650_v4 = vsel %vm649_vm4, 0.0, %v646_v2  ;;  %638 = vst [vmem:[%s624_s23] sm:$0x3] %v637_v3  ;;  %v718_v5 = vld [vmem:[%s1970_s25] sm:$0x3] }
 0x223   : >> { %651 = vst [vmem:[%s639_s24] sm:$0x3] %v650_v4  ;;  %719 = vrot.lane.b32.xlu0 %v718_v5, %s1770_s28  ;;  %v714_v11 = vld [vmem:[%s1973_s11] sm:$0x3] }
 0x224   : >> { %v735_v12 = vld [vmem:[%s1973_s11] sm:$0x3] }
 0x225   : >> { %v717_v30 = vld [vmem:[%s1970_s25] sm:$0x3] }
 0x229   : >> { %v686_v8 = vld [vmem:[%s680_s29] sm:$0x3] }
 0x22a   : >> { %687 = vrot.lane.b32.xlu1 %v686_v8, %s1770_s28  ;;  %v682_v9 = vld [vmem:[%s681_s30] sm:$0x3] }
 0x22b   : >> { %v703_v10 = vld [vmem:[%s681_s30] sm:$0x3] }
 0x22c   : >> { %v685_v18 = vld [vmem:[%s680_s29] sm:$0x3] }
 0x22e   : >> { %683 = vrot.lane.b32.xlu1 %v682_v9, %s1770_s28 }
 0x232   : >> { %704 = vrot.lane.b32.xlu1 %v703_v10, %s1771_s10 }
 0x236   : >> { %715 = vrot.lane.b32.xlu1 %v714_v11, %s1770_s28 }
 0x23a   : >> { %736 = vrot.lane.b32.xlu1 %v735_v12, %s1771_s10 }
 0x295   : >> { %v720_v20 = vpop.permute.xlu0 %719 }
 0x296   : >> { %v724_v22 = vsel %vm691_vm5, %v718_v5, %v720_v20 }
 0x29c   : >> { %v688_v13 = vpop.permute.xlu1 %687 }
 0x29d   : >> { %v692_v14 = vsel %vm691_vm5, %v686_v8, %v688_v13 }
 0x2a0   : >> { %v684_v15 = vpop.permute.xlu1 %683 }
 0x2a1   : >> { %v696_v16 = vsel %vm695_vm6, %v684_v15, %v692_v14 }
 0x2a2   : >> { %v702_v17 = vsel %vm1471_vm2, %v696_v16, 0.0 }
 0x2a3   : >> { %710 = vst [vmem:[%s680_s29] sm:$0x3] %v702_v17 }
 0x2a4   : >> { %v705_v19 = vpop.permute.xlu1 %704 }
 0x2a5   : >> { %v709_v21 = vsel %vm695_vm6, %v685_v18, %v705_v19 }
 0x2a6   : >> { %711 = vst [vmem:[%s681_s30] sm:$0x3] %v709_v21 }
 0x2a8   : >> { %v716_v23 = vpop.permute.xlu1 %715 }
 0x2a9   : >> { %v728_v24 = vsel %vm695_vm6, %v716_v23, %v724_v22 }
 0x2aa   : >> { %v746_v25 = vld [vmem:[%s744_s12] ss:$0 sm:$0xff]  ;;  %v1685_v27 = vld [vmem:[%s744_s12 + $0x1] ss:$0 sm:$0xff]  ;;  %v734_v29 = vsel %vm1471_vm2, %v728_v24, 0.0 }
 0x2ab   : >> { %v1684_v26 = vld [vmem:[%s744_s12 - $0x1] sm:$0x2]  ;;  %742 = vst [vmem:[%s1970_s25] sm:$0x3] %v734_v29 }
 0x2ac   : >> { %v753_v28 = vsel %vm752_vm14, %v746_v25, %v1684_v26  ;;  %v737_v31 = vpop.permute.xlu1 %736 }
 0x2ad   : >> { %756 = vst [vmem:[%s744_s12] sm:$0x3] %v753_v28  ;;  %v770_v32 = vld [vmem:[%s768_s13] ss:$0 sm:$0xff]  ;;  %v1689_v34 = vld [vmem:[%s768_s13 + $0x1] ss:$0 sm:$0xff]  ;;  %v741_v35 = vsel %vm695_vm6, %v717_v30, %v737_v31 }
 0x2ae   : >> { %v1688_v33 = vld [vmem:[%s768_s13 - $0x1] sm:$0x2]  ;;  %743 = vst [vmem:[%s1973_s11] sm:$0x3] %v741_v35 }
 0x2af   : >> { %v777_v36 = vsel %vm752_vm14, %v770_v32, %v1688_v33 }
 0x2b0   : >> { %780 = vst [vmem:[%s768_s13] sm:$0x3] %v777_v36 }
 0x2b2   : >> { %v757_v37 = vld [vmem:[%s745_s14] ss:$0 sm:$0xff]  ;;  %v1687_v38 = vld [vmem:[%s745_s14 + $0x1] sm:$0x1] }
 0x2b3   : >> { %1686 = vst [vmem:[%s744_s12 + $0x1] sm:$0x1] %v757_v37  ;;  %v765_v39 = vsel %vm764_vm15, %v1685_v27, %v1687_v38 }
 0x2b4   : >> { %767 = vst [vmem:[%s745_s14] sm:$0x3] %v765_v39 }
 0x2b5   : >> { %v781_v40 = vld [vmem:[%s769_s15] ss:$0 sm:$0xff]  ;;  %v1691_v41 = vld [vmem:[%s769_s15 + $0x1] sm:$0x1] }
 0x2b6   : >> { %1690 = vst [vmem:[%s768_s13 + $0x1] sm:$0x1] %v781_v40  ;;  %v789_v42 = vsel %vm764_vm15, %v1689_v34, %v1691_v41 }
 0x2b7   : >> { %791 = vst [vmem:[%s769_s15] sm:$0x3] %v789_v42  ;;  %427 = sbr.rel (!%p425_p1) target bundleno = 251 (0xfb), region = 435 }
 0x2ba   : > { %v339_v43 = vld [vmem:[%s333_s0] sm:$0x3] (%p425_p1) }
 0x2bb   : > { %v340_v45 = vsel (%p425_p1), %vm1471_vm2, %v339_v43, 0.0  ;;  %v375_v47 = vld [vmem:[%s369_s2] sm:$0x3] (%p425_p1) }
 0x2bc   : > { %v341_v49 = vmul.f32 %v340_v45, %v340_v45  ;;  %v376_v51 = vsel %vm1471_vm2, %v375_v47, 0.0 }
 0x2bd   : > { %v358_v44 = vld [vmem:[%s352_s1] sm:$0x3]  ;;  %v377_v53 = vmul.f32 %v376_v51, %v376_v51 }
 0x2be   : > { %v359_v46 = vsel %vm1471_vm2, %v358_v44, 0.0  ;;  %v392_v48 = vld [vmem:[%s386_s3] sm:$0x3]  ;;  %v345_v56 = vsel %vm344_vm7, 0.0, %v341_v49 }
 0x2bf   : > { %v360_v50 = vmul.f32 %v359_v46, %v359_v46  ;;  %v393_v52 = vsel %vm1471_vm2, %v392_v48, 0.0 }
 0x2c0   : > { %v394_v55 = vmul.f32 %v393_v52, %v393_v52 }
 0x2c1   : > { %v362_v54 = vadd.f32 %v360_v50, %v341_v49  ;;  %v361_v57 = vadd.f32 %v360_v50, %v345_v56 }
 0x2c2   : > { %v398_v60 = vsel %vm397_vm8, 0.0, %v394_v55 }
 0x2c3   : > { %v379_v58 = vadd.f32 %v377_v53, %v362_v54  ;;  %v378_v59 = vadd.f32 %v377_v53, %v361_v57 }
 0x2c5   : > { %v400_v61 = vadd.f32 %v394_v55, %v379_v58  ;;  %v399_v62 = vadd.f32 %v398_v60, %v378_v59 }
 0x2c7   : > { %401 = vadd.xlane.f32.xlu0 %v400_v61 }
 0x2cb   : > { %409 = vadd.xlane.f32.xlu0 %v399_v62 }
 0x350   : > { %v402_v63 = vpop.xlane.xlu0 %401 }
 0x351   : > { %v403_v0 = vrot.slane %v402_v63, 4 }
 0x353   : > { %v404_v1 = vadd.f32 %v403_v0, %v402_v63 }
 0x354   : > { %v410_v2 = vpop.xlane.xlu0 %409 }
 0x355   : > { %v405_v3 = vrot.slane %v404_v1, 2  ;;  %v411_v4 = vrot.slane %v410_v2, 4 }
 0x357   : > { %v412_v5 = vadd.f32 %v411_v4, %v410_v2  ;;  %v406_v8 = vadd.f32 %v405_v3, %v404_v1 }
 0x359   : > { %v413_v9 = vrot.slane %v412_v5, 2  ;;  %v407_v11 = vrot.slane %v406_v8, 1 }
 0x35b   : > { %v414_v10 = vadd.f32 %v413_v9, %v412_v5  ;;  %v408_v14 = vadd.f32 %v407_v11, %v406_v8 }
 0x35d   : > { %v415_v12 = vrot.slane %v414_v10, 1 }
 0x35f   : > { %v416_v13 = vadd.f32 %v415_v12, %v414_v10 }
 0x361   : > { %1722 = vpush %v416_v13 }
 0x362   : > { %1724 = vpush %v408_v14 }
 0x392   : > { %s1723_s27 = spop %1722 }
 0x393   : > { %s1725_s17 = spop %1724 }
 0x394   : > { %s419_s18 = smul.f32 1e-10, %s1725_s17 }
 0x396   : > { %p420_p3 = scmp.le.f32.partialorder %s1723_s27, %s419_s18 }
 0x398   : > { %p422_p4 = por %p421_p2, %p420_p3 }
 0x39a   :  { %870 = sbr.rel (!%p422_p4) target bundleno = 250 (0xfa), region = 446 }
 0x39f PF:  { %s871_s19 = smov [#allocation20]  ;;  %v875_v6 = vmov %v1834_v6  ;;  %v878_v7 = vmov %v1836_v7  ;;  %v931_v15 = vld [vmem:[#allocation12] sm:$0x3]  ;;  %v939_v16 = vld [vmem:[#allocation14] sm:$0x3]  ;;  %s891_s20 = smov [#allocation23] }
 0x3a0   :  { %v895_v6 = vmov %v1834_v6  ;;  %v898_v7 = vmov %v1836_v7  ;;  %v879_v17 = vld [vmem:[%s871_s19] sm:$0x3]  ;;  %vm882_vm9 = vcmp.eq.s32.totalorder %v878_v7, %v875_v6  ;;  %934 = vst [vmem:[#allocation13] sm:$0x3] %v931_v15  ;;  %942 = vst [vmem:[#allocation15] sm:$0x3] %v939_v16 }
 0x3a1   :  { %vm902_vm10 = vcmp.eq.s32.totalorder %v898_v7, %v895_v6  ;;  %v947_v18 = vld [vmem:[#allocation16] sm:$0x3]  ;;  %v883_v19 = vsel %vm882_vm9, %v879_v17, 0.0  ;;  %v899_v20 = vld [vmem:[%s891_s20] sm:$0x3]  ;;  %s872_s30 = smov [#allocation8] }
 0x3a2   :  { %950 = vst [vmem:[#allocation17] sm:$0x3] %v947_v18  ;;  %v955_v21 = vld [vmem:[#allocation18] sm:$0x3]  ;;  %v884_v22 = vrot.slane %v883_v19, 4  ;;  %v903_v23 = vsel %vm902_vm10, %v899_v20, 0.0 }
 0x3a3   :  { %958 = vst [vmem:[#allocation19] sm:$0x3] %v955_v21  ;;  %v904_v24 = vrot.slane %v903_v23, 4 }
 0x3a4   :  { %v885_v25 = vadd.f32 %v884_v22, %v883_v19 }
 0x3a5   :  { %v905_v26 = vadd.f32 %v904_v24, %v903_v23 }
 0x3a6   :  { %v886_v27 = vrot.slane %v885_v25, 2 }
 0x3a7   :  { %v906_v28 = vrot.slane %v905_v26, 2  ;;  %v1150_v29 = vld [vmem:[#allocation13] sm:$0x3]  ;;  %v1213_v30 = vld [vmem:[#allocation15] sm:$0x3] }
 0x3a8   :  { %v887_v31 = vadd.f32 %v886_v27, %v885_v25  ;;  %1151 = vst [vmem:[%s2057_s6] sm:$0x3] %v1150_v29  ;;  %1214 = vst [vmem:[%s2058_s7] sm:$0x3] %v1213_v30  ;;  %s892_s6 = smov [#allocation10] }
 0x3a9   :  { %v1276_v6 = vld [vmem:[#allocation17] sm:$0x3]  ;;  %v907_v7 = vadd.f32 %v906_v28, %v905_v26 }
 0x3aa   :  { %1277 = vst [vmem:[%s2059_s8] sm:$0x3] %v1276_v6  ;;  %v1339_v32 = vld [vmem:[#allocation19] sm:$0x3]  ;;  %v888_v33 = vrot.slane %v887_v31, 1 }
 0x3ab   :  { %1340 = vst [vmem:[%s2060_s9] sm:$0x3] %v1339_v32  ;;  %v908_v34 = vrot.slane %v907_v7, 1 }
 0x3ac   :  { %v889_v35 = vadd.f32 %v888_v33, %v887_v31 }
 0x3ad   :  { %v909_v36 = vadd.f32 %v908_v34, %v907_v7 }
 0x3ae   :  { %890 = vst [vmem:[%s872_s30] sm:$0x1] %v889_v35 }
 0x3af   :  { %910 = vst [vmem:[%s892_s6] sm:$0x1] %v909_v36 }
 0x3b5   :  { %v915_v37 = vld [vmem:[#allocation8] sm:$0x1] }
 0x3b6   :  { %918 = vst [vmem:[#allocation9] sm:$0x1] %v915_v37  ;;  %v923_v38 = vld [vmem:[#allocation10] sm:$0x1] }
 0x3b7   :  { %926 = vst [vmem:[#allocation11] sm:$0x1] %v923_v38 }
 0x3bd   :  { %v1022_v39 = vld [vmem:[#allocation9] sm:$0x1] }
 0x3be   :  { %1023 = vst [vmem:[%s2055_s4] sm:$0x1] %v1022_v39  ;;  %v1087_v40 = vld [vmem:[#allocation11] sm:$0x1] }
 0x3bf   :  { %1088 = vst [vmem:[%s2056_s5] sm:$0x1] %v1087_v40 }

// kernel: custom-call.16
= control target key start
LH: loop header
LB: loop body
LE: loop exit
PB: predicated region body
PF: predicated region fallthrough
CT: control target
= control target key end

     0   :  { %v340_v1 = vmov 0.0   ;;  %s360_s11 = smov 0   ;;  %s416_s0 = inlined_call_operand.vmem [shape: f32[3,3], index: 0, kind: input, shape index: {}]   ;;  %s417_s1 = inlined_call_operand.vmem [shape: f32[3,3], index: 1, kind: output, shape index: {0}]   ;;  %s418_s2 = inlined_call_operand.vmem [shape: f32[3], index: 2, kind: output, shape index: {1}]  }
   0x1   :  { %v20_v0 = vld [vmem:[%s416_s0] sm:$0xf]  ;;  %44 = vst [vmem:[#allocation4] sm:$0x1] %v340_v1 }
   0x2   :  { %21 = vst [vmem:[#allocation1] sm:$0xf] %v20_v0 }
   0x9   :  { %v40_v2 = vld [vmem:[#allocation1] sm:$0xf] }
   0xa   :  { %41 = vst [vmem:[#allocation0] sm:$0xf] %v40_v2 }
  0x11   :  { %v42_v3 = vld [vmem:[#allocation0] sm:$0xff] }
  0x12   :  { %43 = vst [vmem:[#allocation2] sm:$0xff] %v42_v3 }
  0x13 LB: > { %v52_v4 = vlaneseq  ;;  %v369_v6 = vstv %s338_s11  ;;  %s79_s0 = scalar_lea.vmem [#allocation2], %s338_s11  ;;  %s115_s12 = smov [#allocation2]  ;;  %v341_v60 = vmov 1.0   ;;  %v150_v61 = vld [vmem:[#allocation4] ss:$0 sm:$0xff]  ;;  %s338_s11 = sphi %s360_s11, %s50_s11  }
  0x14   : > { %s137_s13 = scalar_lea.vmem [#allocation6], %s338_s11  ;;  %s153_s14 = smov [#allocation2] }
  0x15   : > { %v366_v5 = vshrl.u32 %v52_v4, 7  ;;  %v131_v49 = vand.u32 127, %v52_v4  ;;  %s154_s15 = smov [#allocation6] }
  0x17   : > { %vm56_vm0 = vcmp.gt.s32.totalorder %v366_v5, %v369_v6  ;;  %vm57_vm1 = vcmp.lt.s32.totalorder %v366_v5, 3  ;;  %v118_v5 = vmov %v366_v5  ;;  %vm384_vm12 = vcmp.eq.s32.totalorder %v131_v49, %v369_v6 }
  0x18   : > { %vm58_vm2 = vmand %vm56_vm0, %vm57_vm1  ;;  %vm122_vm9 = vcmp.gt.s32.totalorder %v118_v5, %v369_v6  ;;  %vm123_vm10 = vcmp.lt.s32.totalorder %v118_v5, 3  ;;  %v157_v5 = vmov %v366_v5  ;;  %vm183_vm15 = vcmp.gt.s32.totalorder %v131_v49, %v369_v6 }
  0x19   : > { %v51_v7 = vld [vmem:[#allocation2] sm:$0xff]  ;;  %v80_v16 = vld [vmem:[%s79_s0] ss:$0 sm:$0xff]  ;;  %vm124_vm11 = vmand %vm122_vm9, %vm123_vm10  ;;  %vm162_vm13 = vcmp.lt.s32.totalorder %v157_v5, 3  ;;  %v174_v5 = vmov %v366_v5 }
  0x1a   : > { %v59_v8 = vsel %vm58_vm2, %v51_v7, 0.0  ;;  %v81_v17 = vand.u32 2147483647, %v80_v16  ;;  %vm106_vm8 = vcmp.lt.f32.partialorder %v80_v16, 0.0  ;;  %v119_v46 = vld [vmem:[%s115_s12] sm:$0xff]  ;;  %vm191_vm14 = vcmp.ge.s32.totalorder %v174_v5, %v369_v6 }
  0x1b   : > { %v60_v9 = vmul.f32 %v59_v8, %v59_v8  ;;  %v125_v50 = vsel %vm124_vm11, %v119_v46, 0.0  ;;  %v160_v0 = vld [vmem:[%s153_s14] sm:$0xff]  ;;  %s170_s14 = smov %s153_s14  ;;  %vm192_vm0 = vmand %vm384_vm12, %vm191_vm14 }
  0x1c   : > { %v82_v22 = vmax.f32 %v81_v17, 0.0  ;;  %s195_s16 = scalar_lea.vmem %s170_s14, %s338_s11  ;;  %s50_s11 = sadd.s32 1, %s338_s11  }
  0x1d   : > { %v61_v10 = vrot.slane %v60_v9, 4  ;;  %p47_p0 = scmp.ge.s32.totalorder %s50_s11, 3  }
  0x1f   : > { %v62_v11 = vadd.f32 %v61_v10, %v60_v9 }
  0x21   : > { %v63_v12 = vrot.slane %v62_v11, 2 }
  0x23   : > { %v64_v13 = vadd.f32 %v63_v12, %v62_v11 }
  0x25   : > { %v65_v14 = vrot.slane %v64_v13, 1 }
  0x27   : > { %v66_v15 = vadd.f32 %v65_v14, %v64_v13  ;;  %v181_v14 = vld [vmem:[%s170_s14] sm:$0xff] }
  0x29   : > { %322 = vrsqrt.f32 %v66_v15  ;;  %vm69_vm3 = vcmp.eq.f32.partialorder %v66_v15, inf  ;;  %v72_v19 = vand.u32 2147483648, %v66_v15  ;;  %vm71_vm4 = vcmp.eq.f32.partialorder %v66_v15, 0.0 }
  0x36   : > { %v323_v18 = vpop.eup %322 }
  0x37   : > { %v68_v20 = vmul.f32 %v323_v18, %v66_v15 }
  0x39   : > { %v70_v21 = vsel %vm69_vm3, %v66_v15, %v68_v20 }
  0x3a   : > { %v73_v23 = vsel %vm71_vm4, %v72_v19, %v70_v21 }
  0x3b   : > { %v83_v24 = vand.u32 2147483647, %v73_v23 }
  0x3d   : > { %v84_v25 = vmax.f32 %v82_v22, %v83_v24 }
  0x3f   : > { %324 = vrcp.f32 %v84_v25  ;;  %vm96_vm7 = vcmp.eq.f32.partialorder %v84_v25, 0.0 }
  0x4c   : > { %v325_v26 = vpop.eup %324 }
  0x4d   : > { %v86_v27 = vmul.f32 %v325_v26, %v81_v17  ;;  %v89_v28 = vmul.f32 0.0, %v325_v26  ;;  %v93_v29 = vmul.f32 %v325_v26, %v83_v24 }
  0x4f   : > { %v87_v30 = vmul.f32 %v86_v27, %v86_v27  ;;  %v90_v31 = vmul.f32 %v89_v28, %v89_v28  ;;  %v94_v32 = vmul.f32 %v93_v29, %v93_v29 }
  0x51   : > { %v91_v33 = vadd.f32 %v90_v31, %v87_v30 }
  0x53   : > { %v95_v34 = vadd.f32 %v94_v32, %v91_v33 }
  0x55   : > { %326 = vrsqrt.f32 %v95_v34  ;;  %vm99_vm5 = vcmp.eq.f32.partialorder %v95_v34, inf  ;;  %v102_v36 = vand.u32 2147483648, %v95_v34  ;;  %vm101_vm6 = vcmp.eq.f32.partialorder %v95_v34, 0.0 }
  0x62   : > { %v327_v35 = vpop.eup %326 }
  0x63   : > { %v98_v37 = vmul.f32 %v327_v35, %v95_v34 }
  0x65   : > { %v100_v38 = vsel %vm99_vm5, %v95_v34, %v98_v37 }
  0x66   : > { %v103_v39 = vsel %vm101_vm6, %v102_v36, %v100_v38 }
  0x67   : > { %v104_v40 = vmul.f32 %v103_v39, %v84_v25 }
  0x69   : > { %v105_v41 = vsel %vm96_vm7, 0.0, %v104_v40 }
  0x6a   : > { %v107_v42 = vxor.u32 2147483648, %v105_v41 }
  0x6c   : > { %v108_v43 = vsel %vm106_vm8, %v105_v41, %v107_v42 }
  0x6d   : > { %v377_v44 = vsel %vm71_vm4, %v80_v16, %v108_v43  ;;  %328 = vrcp.f32 %v108_v43  ;;  %v109_v47 = vsub.f32 %v108_v43, %v80_v16 }
  0x6e   : > { %v114_v45 = vsub.f32 %v80_v16, %v377_v44 }
  0x70   : > { %330 = vrcp.f32 %v114_v45 }
  0x7a   : > { %v329_v48 = vpop.eup %328 }
  0x7b   : > { %v111_v51 = vmul.f32 %v329_v48, %v109_v47 }
  0x7d   : > { %v331_v52 = vpop.eup %330  ;;  %v113_v56 = vsel %vm71_vm4, 0.0, %v111_v51 }
  0x7e   : > { %v127_v53 = vmul.f32 %v331_v52, %v125_v50  ;;  %v143_v58 = vsel %vm384_vm12, %v113_v56, 0.0 }
  0x80   : > { %v128_v55 = vsel %vm71_vm4, 0.0, %v127_v53 }
  0x81   : > { %v133_v57 = vsel %vm384_vm12, %v128_v55, 0.0 }
  0x82   : > { %134 = vadd.xlane.f32.xlu0 %v133_v57 }
  0x86   : > { %144 = vadd.xlane.f32.xlu0 %v143_v58 }
 0x10b   : > { %v135_v59 = vpop.xlane.xlu0 %134 }
 0x10c   : > { %136 = vst [vmem:[#allocation6] sm:$0xff] %v135_v59 }
 0x10d   : > { %138 = vst [vmem:[%s137_s13] sm:$0x1] %v341_v60 }
 0x10f   : > { %v145_v62 = vpop.xlane.xlu0 %144 }
 0x110   : > { %v151_v63 = vsel %vm384_vm12, %v145_v62, %v150_v61 }
 0x111   : > { %152 = vst [vmem:[#allocation4] sm:$0x1] %v151_v63 }
 0x114   : > { %v159_v1 = vld [vmem:[%s154_s15] sm:$0xff]  ;;  %s171_s15 = smov %s154_s15 }
 0x115   : > { %v161_v2 = vmul.f32 %v160_v0, %v159_v1  ;;  %v179_v13 = vld [vmem:[%s171_s15] sm:$0xff] }
 0x117   : > { %v163_v3 = vsel %vm162_vm13, %v161_v2, 0.0 }
 0x118   : > { %v164_v4 = vrot.slane %v163_v3, 4  ;;  %v215_v6 = vld [vmem:[#allocation4] sm:$0x1] (%p47_p0) }
 0x119   :  { %218 = vst [vmem:[#allocation5] sm:$0x1] (%p47_p0), %v215_v6 }
 0x11a   : > { %v165_v7 = vadd.f32 %v164_v4, %v163_v3 }
 0x11c   : > { %v166_v8 = vrot.slane %v165_v7, 2 }
 0x11e   : > { %v167_v9 = vadd.f32 %v166_v8, %v165_v7 }
 0x120   : > { %v168_v10 = vrot.slane %v167_v9, 1  ;;  %v270_v22 = vld [vmem:[#allocation5] sm:$0x1] (%p47_p0) }
 0x121   :  { %271 = vst [vmem:[%s418_s2] sm:$0x1] (%p47_p0), %v270_v22 }
 0x122   : > { %v169_v11 = vadd.f32 %v168_v10, %v167_v9 }
 0x124   : > { %v175_v12 = vmul.f32 %v169_v11, %v145_v62 }
 0x126   : > { %v180_v15 = vmul.f32 %v179_v13, %v175_v12 }
 0x128   : > { %v184_v16 = vsub.f32 %v181_v14, %v180_v15 }
 0x12a   : > { %v185_v17 = vsel %vm183_vm15, %v184_v16, %v181_v14 }
 0x12b   : > { %v193_v18 = vsel %vm192_vm0, %v179_v13, %v185_v17 }
 0x12c   : > { %194 = vst [vmem:[%s170_s14] sm:$0xff] %v193_v18 }
 0x131   :  { %49 = sbr.rel (!%p47_p0) target bundleno = 19 (0x13), region = 131 }
 0x133   : > { %v196_v19 = vld [vmem:[%s195_s16] ss:$0 sm:$0xff] }
 0x134   : > { %v201_v20 = vsel %vm384_vm12, %v377_v44, %v196_v19 }
 0x135   : > { %202 = vst [vmem:[%s195_s16] sm:$0x1] %v201_v20 }
 0x13c   :  { %v207_v5 = vld [vmem:[#allocation2] sm:$0xf] }
 0x13d   :  { %210 = vst [vmem:[#allocation3] sm:$0xf] %v207_v5 }
 0x144   :  { %v235_v21 = vld [vmem:[#allocation3] sm:$0xf] }
 0x145   :  { %236 = vst [vmem:[%s417_s1] sm:$0xf] %v235_v21 }

</bundles_post_ra>
